<compile_context>
chip_gen: v7x
topology: tpu7x:2x2x1
jax: 0.10.0
libtpu: 0.0.40
codegen_flags: <defaults>
</compile_context>

<pallas_src>
import numpy as np
import jax
import jax.numpy as jnp
from jax.experimental import pallas as pl
from jax.experimental.pallas import tpu as pltpu


def bilstm_kernel(xp_ref, mask_ref, wih_ref, whh_ref, b_ref, wc_ref, bc_ref,
                  out_ref,
                  gin, hcat, ccat, outcat):
    """Fused bidirectional LSTM + classifier, whole (small) problem in VMEM.

    Fused 8H gate-axis layout (gate-major, direction-interleaved, H each):
        [ i_f i_b | f_f f_b | g_f g_b | o_f o_b ]
    x_pair rows are [x(t) | x(T-1-t)], so with the block-diagonal wih the row
    block for step s directly yields fwd pre-gates of time s and bwd pre-gates
    of time T-1-s.
    """
    TB = xp_ref.shape[0]
    Bp, H2 = hcat.shape              # H2 == 2*H  ([fwd | bwd] packed on lanes)
    H = H2 // 2
    T = TB // Bp
    mm_dtype = whh_ref.dtype

    # Hoisted input projection for BOTH directions: one MXU matmul, N=8H=256.
    gin[...] = (jnp.dot(xp_ref[...], wih_ref[...],
                        preferred_element_type=jnp.float32) + b_ref[...])

    hcat[...] = jnp.zeros_like(hcat)
    ccat[...] = jnp.zeros_like(ccat)

    # Fused fwd+bwd recurrence, fully unrolled (T static & small).
    # TODO(synk): for large T use lax.fori_loop(..., unroll=2..4) to bound
    # vreg live ranges, and T-chunk `gin` (grid / emit_pipeline) with an
    # explicit vmem_limit_bytes so the resident scratch fits v7x's 64 MiB VMEM.
    for s in range(T):
        rf = slice(s * Bp, (s + 1) * Bp)                # fwd time = s
        rb = slice((T - 1 - s) * Bp, (T - s) * Bp)      # bwd time = T-1-s

        h_prev = hcat[...]
        c_prev = ccat[...]

        # One block-diagonal recurrent matmul drives both directions:
        # (Bp, 2H) x (2H, 8H) -> (Bp, 8H) gates, f32 accumulation.
        gates = gin[rf] + jnp.dot(h_prev.astype(mm_dtype), whh_ref[...],
                                  preferred_element_type=jnp.float32)

        # Full-width activations: one 8H-wide sigmoid stream + one 2H tanh.
        s_all = jax.nn.sigmoid(gates)
        i_g = s_all[:, 0:H2]
        f_g = s_all[:, H2:2 * H2]
        g_g = jnp.tanh(gates[:, 2 * H2:3 * H2])
        o_g = s_all[:, 3 * H2:4 * H2]

        c_new = f_g * c_prev + i_g * g_g
        h_new = o_g * jnp.tanh(c_new)

        # Precomputed per-(step, direction) length mask; lerp update keeps
        # packed-sequence semantics (padded steps freeze state, emit zeros).
        m = mask_ref[rf]
        hcat[...] = h_prev + m * (h_new - h_prev)
        ccat[...] = c_prev + m * (c_new - c_prev)

        mh = m * h_new
        outcat[rf, 0:H] = mh[:, 0:H]        # fwd hidden at time s
        outcat[rb, H:H2] = mh[:, H:H2]      # bwd hidden at time T-1-s

    # Fused classifier: one (T*Bp, 2H) x (2H, Lp) matmul, lane-dense output.
    out_ref[...] = (jnp.dot(outcat[...].astype(wc_ref.dtype), wc_ref[...],
                            preferred_element_type=jnp.float32)
                    + bc_ref[...])


def _round_up(n, m):
    return ((n + m - 1) // m) * m


def _fuse_dir_weights(w_f, w_b, H):
    """Two (K, 4H) per-direction weights -> one (2K, 8H) block-diagonal weight
    with gate-major fused columns [i_f i_b f_f f_b g_f g_b o_f o_b]."""
    K = w_f.shape[0]
    out = jnp.zeros((2 * K, 8 * H), dtype=jnp.float32)
    for g in range(4):
        out = out.at[:K, (2 * g) * H:(2 * g + 1) * H].set(w_f[:, g * H:(g + 1) * H])
        out = out.at[K:, (2 * g + 1) * H:(2 * g + 2) * H].set(w_b[:, g * H:(g + 1) * H])
    return out


def _fuse_bias(b_f, b_b, H):
    parts = []
    for g in range(4):
        parts.append(b_f[:, g * H:(g + 1) * H])
        parts.append(b_b[:, g * H:(g + 1) * H])
    return jnp.concatenate(parts, axis=1)          # (1, 8H), f32


def bilstm_logits(params, input_ids, lengths, use_bf16_matmul=True):
    """Full-length logits (B, T, L); traceable / no host sync."""
    emb = params["embedding"][input_ids]                       # (B, T, E) gather glue
    B, T, E = emb.shape
    H = params["whh_f"].shape[0]
    L = params["bc"].shape[-1]

    Bp = max(8, _round_up(B, 8))                               # sublane padding
    Lp = max(128, _round_up(L, 128))                           # lane-dense output
    mm_dtype = jnp.bfloat16 if use_bf16_matmul else jnp.float32

    # Time-major, batch-padded input; pair x(t) with x(T-1-t) along lanes so a
    # single block-diagonal projection yields step-aligned fwd/bwd pre-gates.
    x_tm = jnp.transpose(emb, (1, 0, 2)).astype(jnp.float32)   # (T, B, E)
    x_tm = jnp.pad(x_tm, ((0, 0), (0, Bp - B), (0, 0)))        # (T, Bp, E)
    x_pair = jnp.concatenate([x_tm, x_tm[::-1]], axis=-1)      # (T, Bp, 2E)
    x_pair = x_pair.reshape(T * Bp, 2 * E).astype(mm_dtype)

    # (T*Bp, 2H) f32 mask table: cols [:H] mask the fwd direction at time s,
    # cols [H:] the bwd direction at time T-1-s.  Padded batch rows -> len 0.
    len_p = jnp.pad(lengths.astype(jnp.int32), (0, Bp - B))
    valid = (jnp.arange(T, dtype=jnp.int32)[:, None] < len_p[None, :]).astype(jnp.float32)
    m_f = jnp.broadcast_to(valid[:, :, None], (T, Bp, H))
    m_b = jnp.broadcast_to(valid[::-1][:, :, None], (T, Bp, H))
    mask2 = jnp.concatenate([m_f, m_b], axis=-1).reshape(T * Bp, 2 * H)

    wih = _fuse_dir_weights(params["wih_f"], params["wih_b"], H).astype(mm_dtype)  # (2E, 8H)
    whh = _fuse_dir_weights(params["whh_f"], params["whh_b"], H).astype(mm_dtype)  # (2H, 8H)
    b_fused = _fuse_bias(params["b_f"], params["b_b"], H)                          # (1, 8H) f32
    wc = jnp.concatenate([params["wc_f"], params["wc_b"]], axis=0)                 # (2H, L)
    wc = jnp.pad(wc, ((0, 0), (0, Lp - L))).astype(mm_dtype)                       # (2H, Lp)
    bc = jnp.pad(params["bc"], ((0, 0), (0, Lp - L)))                              # (1, Lp) f32

    out = pl.pallas_call(
        bilstm_kernel,
        out_shape=jax.ShapeDtypeStruct((T * Bp, Lp), jnp.float32),
        in_specs=[pl.BlockSpec(memory_space=pltpu.MemorySpace.VMEM)] * 7,
        out_specs=pl.BlockSpec(memory_space=pltpu.MemorySpace.VMEM),
        scratch_shapes=[
            pltpu.VMEM((T * Bp, 8 * H), jnp.float32),   # hoisted fused input proj
            pltpu.VMEM((Bp, 2 * H), jnp.float32),       # h state [fwd | bwd]
            pltpu.VMEM((Bp, 2 * H), jnp.float32),       # c state [fwd | bwd]
            pltpu.VMEM((T * Bp, 2 * H), jnp.float32),   # hidden outputs [fwd | bwd]
        ],
        # TODO(synk): at production batch sizes add a batch grid axis with
        # compiler_params=pltpu.CompilerParams(dimension_semantics=("parallel",))
        # so v7x's second TensorCore takes half the batch.
    )(x_pair, mask2, wih, whh, b_fused, wc, bc)

    logits = out.reshape(T, Bp, Lp)[:, :B, :L]                 # (T, B, L)
    return jnp.transpose(logits, (1, 0, 2))                    # (B, T, L)


def bilstm_forward(params, input_ids, lengths, use_bf16_matmul=True):
    logits = bilstm_logits(params, input_ids, lengths, use_bf16_matmul)
    # pad_packed_sequence semantics: truncate to max(lengths). Host sync is
    # intentionally outside the traced kernel computation.
    max_len = int(jnp.max(lengths))
    return logits[:, :max_len, :]


def init_params(key, vocab_size, E, H, L):
    """Deterministic init mirroring PyTorch's default initializers / shapes."""
    ks = jax.random.split(key, 11)
    u = lambda k, shape, b: jax.random.uniform(k, shape, jnp.float32, -b, b)
    s = 1.0 / np.sqrt(H)
    emb = jax.random.normal(ks[0], (vocab_size, E), jnp.float32)
    w_ih_f = u(ks[1], (4 * H, E), s); w_hh_f = u(ks[2], (4 * H, H), s)
    b_ih_f = u(ks[3], (4 * H,), s);   b_hh_f = u(ks[4], (4 * H,), s)
    w_ih_b = u(ks[5], (4 * H, E), s); w_hh_b = u(ks[6], (4 * H, H), s)
    b_ih_b = u(ks[7], (4 * H,), s);   b_hh_b = u(ks[8], (4 * H,), s)
    sc = 1.0 / np.sqrt(2 * H)
    w_cls = u(ks[9], (L, 2 * H), sc); b_cls = u(ks[10], (L,), sc)
    return {
        "embedding": emb,
        "wih_f": w_ih_f.T, "whh_f": w_hh_f.T,                   # (E,4H), (H,4H) [i,f,g,o]
        "b_f": (b_ih_f + b_hh_f).reshape(1, 4 * H),
        "wih_b": w_ih_b.T, "whh_b": w_hh_b.T,
        "b_b": (b_ih_b + b_hh_b).reshape(1, 4 * H),
        "wc_f": w_cls.T[:H], "wc_b": w_cls.T[H:],               # (H,L) each
        "bc": b_cls.reshape(1, L),
    }


def reference_forward(params, input_ids, lengths):
    """Pure-JAX reference with identical packing semantics (for validation)."""
    emb = params["embedding"][input_ids].astype(jnp.float32)
    B, T, E = emb.shape
    H = params["whh_f"].shape[0]

    def run_dir(wih, whh, b, reverse):
        def cell(carry, t):
            h, c = carry
            x_t = emb[:, t, :]
            gates = x_t @ wih + h @ whh + b
            i = jax.nn.sigmoid(gates[:, :H]); f = jax.nn.sigmoid(gates[:, H:2 * H])
            g = jnp.tanh(gates[:, 2 * H:3 * H]); o = jax.nn.sigmoid(gates[:, 3 * H:])
            c_new = f * c + i * g
            h_new = o * jnp.tanh(c_new)
            mask = (t < lengths).astype(jnp.float32)[:, None]
            return (mask * h_new + (1 - mask) * h,
                    mask * c_new + (1 - mask) * c), mask * h_new
        ts = jnp.arange(T)[::-1] if reverse else jnp.arange(T)
        _, outs = jax.lax.scan(cell, (jnp.zeros((B, H)), jnp.zeros((B, H))), ts)
        if reverse:
            outs = outs[::-1]
        return jnp.transpose(outs, (1, 0, 2))                   # (B, T, H)

    of = run_dir(params["wih_f"], params["whh_f"], params["b_f"], False)
    ob = run_dir(params["wih_b"], params["whh_b"], params["b_b"], True)
    logits = of @ params["wc_f"] + ob @ params["wc_b"] + params["bc"]
    max_len = int(jnp.max(lengths))
    return logits[:, :max_len, :]


if __name__ == "__main__":
    vocab_size, embedding_dim, hidden_dim, num_labels = 50, 16, 32, 5
    B, T = 2, 8

    key = jax.random.PRNGKey(0)
    pkey, ikey = jax.random.split(key)
    params = init_params(pkey, vocab_size, embedding_dim, hidden_dim, num_labels)

    input_ids = jax.random.randint(ikey, (B, T), 0, vocab_size, dtype=jnp.int32)
    lengths = jnp.array([T, 5], dtype=jnp.int32)

    ref = reference_forward(params, input_ids, lengths)

    # f32-operand path: exact validation of the fused kernel structure.
    logits_f32 = jax.block_until_ready(
        bilstm_forward(params, input_ids, lengths, use_bf16_matmul=False))
    assert logits_f32.shape == (B, int(jnp.max(lengths)), num_labels)
    np.testing.assert_allclose(np.asarray(logits_f32), np.asarray(ref),
                               atol=1e-3, rtol=1e-3)

    # Default path: bf16 MXU operands, f32 accumulation (looser tolerance —
    # hidden state is re-quantized to bf16 each recurrent step).
    logits_bf16 = jax.block_until_ready(
        bilstm_forward(params, input_ids, lengths))
    assert logits_bf16.shape == (B, int(jnp.max(lengths)), num_labels)
    np.testing.assert_allclose(np.asarray(logits_bf16), np.asarray(ref),
                               atol=5e-2, rtol=5e-2)

    print("KERNEL_OK")
</pallas_src>

<mosaic_0001>
module attributes {stable_mosaic.version = 11 : i64} {
  func.func @bilstm_kernel(%arg0: memref<64x32xf32, #tpu.memory_space<vmem>>, %arg1: memref<64x64xf32, #tpu.memory_space<vmem>>, %arg2: memref<32x256xf32, #tpu.memory_space<vmem>>, %arg3: memref<64x256xf32, #tpu.memory_space<vmem>>, %arg4: memref<1x256xf32, #tpu.memory_space<vmem>>, %arg5: memref<64x128xf32, #tpu.memory_space<vmem>>, %arg6: memref<1x128xf32, #tpu.memory_space<vmem>>, %arg7: memref<64x128xf32, #tpu.memory_space<vmem>>, %arg8: memref<64x256xf32, #tpu.memory_space<vmem>>, %arg9: memref<8x64xf32, #tpu.memory_space<vmem>>, %arg10: memref<8x64xf32, #tpu.memory_space<vmem>>, %arg11: memref<64x64xf32, #tpu.memory_space<vmem>>) attributes {dimension_semantics = [], scalar_prefetch = 0 : i64, scratch_operands = 4 : i64, tpu.core_type = #tpu.core_type<tc>} {
    %c0 = arith.constant 0 : index
    %c0_0 = arith.constant 0 : index
    %0 = vector.load %arg0[%c0, %c0_0] : memref<64x32xf32, #tpu.memory_space<vmem>>, vector<64x32xf32>
    %c0_1 = arith.constant 0 : index
    %c0_2 = arith.constant 0 : index
    %1 = vector.load %arg2[%c0_1, %c0_2] : memref<32x256xf32, #tpu.memory_space<vmem>>, vector<32x256xf32>
    %cst = arith.constant dense<0.000000e+00> : vector<64x256xf32>
    %2 = tpu.matmul %0, %1, %cst {dimension_numbers = #tpu.dot_dimension_numbers<[1], [0], [0], [1], [0, 0, 1, 1], [], []>} : vector<64x32xf32>, vector<32x256xf32>, vector<64x256xf32> -> vector<64x256xf32>
    %c0_3 = arith.constant 0 : index
    %c0_4 = arith.constant 0 : index
    %3 = vector.load %arg4[%c0_3, %c0_4] : memref<1x256xf32, #tpu.memory_space<vmem>>, vector<1x256xf32>
    %4 = vector.broadcast %3 : vector<1x256xf32> to vector<64x256xf32>
    %5 = arith.addf %2, %4 : vector<64x256xf32>
    %c0_5 = arith.constant 0 : index
    %c0_6 = arith.constant 0 : index
    %6 = vector.load %arg8[%c0_5, %c0_6] : memref<64x256xf32, #tpu.memory_space<vmem>>, vector<64x256xf32>
    tpu.vector_store %arg8[%c0_5, %c0_6], %5 {strides = array<i32>} : memref<64x256xf32, #tpu.memory_space<vmem>>, vector<64x256xf32>,
    %cst_7 = arith.constant 0.000000e+00 : f32
    %7 = vector.broadcast %cst_7 : f32 to vector<8x64xf32>
    %c0_8 = arith.constant 0 : index
    %c0_9 = arith.constant 0 : index
    %8 = vector.load %arg9[%c0_8, %c0_9] : memref<8x64xf32, #tpu.memory_space<vmem>>, vector<8x64xf32>
    tpu.vector_store %arg9[%c0_8, %c0_9], %7 {strides = array<i32>} : memref<8x64xf32, #tpu.memory_space<vmem>>, vector<8x64xf32>,
    %cst_10 = arith.constant 0.000000e+00 : f32
    %9 = vector.broadcast %cst_10 : f32 to vector<8x64xf32>
    %c0_11 = arith.constant 0 : index
    %c0_12 = arith.constant 0 : index
    %10 = vector.load %arg10[%c0_11, %c0_12] : memref<8x64xf32, #tpu.memory_space<vmem>>, vector<8x64xf32>
    tpu.vector_store %arg10[%c0_11, %c0_12], %9 {strides = array<i32>} : memref<8x64xf32, #tpu.memory_space<vmem>>, vector<8x64xf32>,
    %c0_13 = arith.constant 0 : index
    %c0_14 = arith.constant 0 : index
    %11 = vector.load %arg9[%c0_13, %c0_14] : memref<8x64xf32, #tpu.memory_space<vmem>>, vector<8x64xf32>
    %c0_15 = arith.constant 0 : index
    %c0_16 = arith.constant 0 : index
    %12 = vector.load %arg10[%c0_15, %c0_16] : memref<8x64xf32, #tpu.memory_space<vmem>>, vector<8x64xf32>
    %c0_17 = arith.constant 0 : index
    %c0_18 = arith.constant 0 : index
    %13 = vector.load %arg8[%c0_17, %c0_18] : memref<64x256xf32, #tpu.memory_space<vmem>>, vector<8x256xf32>
    %c0_19 = arith.constant 0 : index
    %c0_20 = arith.constant 0 : index
    %14 = vector.load %arg3[%c0_19, %c0_20] : memref<64x256xf32, #tpu.memory_space<vmem>>, vector<64x256xf32>
    %cst_21 = arith.constant dense<0.000000e+00> : vector<8x256xf32>
    %15 = tpu.matmul %11, %14, %cst_21 {dimension_numbers = #tpu.dot_dimension_numbers<[1], [0], [0], [1], [0, 0, 1, 1], [], []>} : vector<8x64xf32>, vector<64x256xf32>, vector<8x256xf32> -> vector<8x256xf32>
    %16 = arith.addf %13, %15 : vector<8x256xf32>
    %17 = arith.negf %16 : vector<8x256xf32>
    %18 = math.exp %17 : vector<8x256xf32>
    %cst_22 = arith.constant 1.000000e+00 : f32
    %19 = vector.broadcast %cst_22 : f32 to vector<8x256xf32>
    %20 = arith.addf %19, %18 : vector<8x256xf32>
    %21 = arith.divf %19, %20 : vector<8x256xf32>
    %22 = vector.extract_strided_slice %21 {offsets = [0, 0], sizes = [8, 64], strides = [1, 1]} : vector<8x256xf32> to vector<8x64xf32>
    %23 = vector.extract_strided_slice %21 {offsets = [0, 64], sizes = [8, 64], strides = [1, 1]} : vector<8x256xf32> to vector<8x64xf32>
    %24 = vector.extract_strided_slice %16 {offsets = [0, 128], sizes = [8, 64], strides = [1, 1]} : vector<8x256xf32> to vector<8x64xf32>
    %25 = math.tanh %24 : vector<8x64xf32>
    %26 = vector.extract_strided_slice %21 {offsets = [0, 192], sizes = [8, 64], strides = [1, 1]} : vector<8x256xf32> to vector<8x64xf32>
    %27 = arith.mulf %23, %12 : vector<8x64xf32>
    %28 = arith.mulf %22, %25 : vector<8x64xf32>
    %29 = arith.addf %27, %28 : vector<8x64xf32>
    %30 = math.tanh %29 : vector<8x64xf32>
    %31 = arith.mulf %26, %30 : vector<8x64xf32>
    %c0_23 = arith.constant 0 : index
    %c0_24 = arith.constant 0 : index
    %32 = vector.load %arg1[%c0_23, %c0_24] : memref<64x64xf32, #tpu.memory_space<vmem>>, vector<8x64xf32>
    %33 = arith.subf %31, %11 : vector<8x64xf32>
    %34 = arith.mulf %32, %33 : vector<8x64xf32>
    %35 = arith.addf %11, %34 : vector<8x64xf32>
    %c0_25 = arith.constant 0 : index
    %c0_26 = arith.constant 0 : index
    %36 = vector.load %arg9[%c0_25, %c0_26] : memref<8x64xf32, #tpu.memory_space<vmem>>, vector<8x64xf32>
    tpu.vector_store %arg9[%c0_25, %c0_26], %35 {strides = array<i32>} : memref<8x64xf32, #tpu.memory_space<vmem>>, vector<8x64xf32>,
    %37 = arith.subf %29, %12 : vector<8x64xf32>
    %38 = arith.mulf %32, %37 : vector<8x64xf32>
    %39 = arith.addf %12, %38 : vector<8x64xf32>
    %c0_27 = arith.constant 0 : index
    %c0_28 = arith.constant 0 : index
    %40 = vector.load %arg10[%c0_27, %c0_28] : memref<8x64xf32, #tpu.memory_space<vmem>>, vector<8x64xf32>
    tpu.vector_store %arg10[%c0_27, %c0_28], %39 {strides = array<i32>} : memref<8x64xf32, #tpu.memory_space<vmem>>, vector<8x64xf32>,
    %41 = arith.mulf %32, %31 : vector<8x64xf32>
    %42 = vector.extract_strided_slice %41 {offsets = [0, 0], sizes = [8, 32], strides = [1, 1]} : vector<8x64xf32> to vector<8x32xf32>
    %c0_29 = arith.constant 0 : index
    %c0_30 = arith.constant 0 : index
    %43 = vector.load %arg11[%c0_29, %c0_30] : memref<64x64xf32, #tpu.memory_space<vmem>>, vector<8x32xf32>
    tpu.vector_store %arg11[%c0_29, %c0_30], %42 {strides = array<i32>} : memref<64x64xf32, #tpu.memory_space<vmem>>, vector<8x32xf32>,
    %44 = vector.extract_strided_slice %41 {offsets = [0, 32], sizes = [8, 32], strides = [1, 1]} : vector<8x64xf32> to vector<8x32xf32>
    %c56 = arith.constant 56 : index
    %c32 = arith.constant 32 : index
    %45 = vector.load %arg11[%c56, %c32] : memref<64x64xf32, #tpu.memory_space<vmem>>, vector<8x32xf32>
    tpu.vector_store %arg11[%c56, %c32], %44 {strides = array<i32>} : memref<64x64xf32, #tpu.memory_space<vmem>>, vector<8x32xf32>,
    %c0_31 = arith.constant 0 : index
    %c0_32 = arith.constant 0 : index
    %46 = vector.load %arg9[%c0_31, %c0_32] : memref<8x64xf32, #tpu.memory_space<vmem>>, vector<8x64xf32>
    %c0_33 = arith.constant 0 : index
    %c0_34 = arith.constant 0 : index
    %47 = vector.load %arg10[%c0_33, %c0_34] : memref<8x64xf32, #tpu.memory_space<vmem>>, vector<8x64xf32>
    %c8 = arith.constant 8 : index
    %c0_35 = arith.constant 0 : index
    %48 = vector.load %arg8[%c8, %c0_35] : memref<64x256xf32, #tpu.memory_space<vmem>>, vector<8x256xf32>
    %c0_36 = arith.constant 0 : index
    %c0_37 = arith.constant 0 : index
    %49 = vector.load %arg3[%c0_36, %c0_37] : memref<64x256xf32, #tpu.memory_space<vmem>>, vector<64x256xf32>
    %cst_38 = arith.constant dense<0.000000e+00> : vector<8x256xf32>
    %50 = tpu.matmul %46, %49, %cst_38 {dimension_numbers = #tpu.dot_dimension_numbers<[1], [0], [0], [1], [0, 0, 1, 1], [], []>} : vector<8x64xf32>, vector<64x256xf32>, vector<8x256xf32> -> vector<8x256xf32>
    %51 = arith.addf %48, %50 : vector<8x256xf32>
    %52 = arith.negf %51 : vector<8x256xf32>
    %53 = math.exp %52 : vector<8x256xf32>
    %cst_39 = arith.constant 1.000000e+00 : f32
    %54 = vector.broadcast %cst_39 : f32 to vector<8x256xf32>
    %55 = arith.addf %54, %53 : vector<8x256xf32>
    %56 = arith.divf %54, %55 : vector<8x256xf32>
    %57 = vector.extract_strided_slice %56 {offsets = [0, 0], sizes = [8, 64], strides = [1, 1]} : vector<8x256xf32> to vector<8x64xf32>
    %58 = vector.extract_strided_slice %56 {offsets = [0, 64], sizes = [8, 64], strides = [1, 1]} : vector<8x256xf32> to vector<8x64xf32>
    %59 = vector.extract_strided_slice %51 {offsets = [0, 128], sizes = [8, 64], strides = [1, 1]} : vector<8x256xf32> to vector<8x64xf32>
    %60 = math.tanh %59 : vector<8x64xf32>
    %61 = vector.extract_strided_slice %56 {offsets = [0, 192], sizes = [8, 64], strides = [1, 1]} : vector<8x256xf32> to vector<8x64xf32>
    %62 = arith.mulf %58, %47 : vector<8x64xf32>
    %63 = arith.mulf %57, %60 : vector<8x64xf32>
    %64 = arith.addf %62, %63 : vector<8x64xf32>
    %65 = math.tanh %64 : vector<8x64xf32>
    %66 = arith.mulf %61, %65 : vector<8x64xf32>
    %c8_40 = arith.constant 8 : index
    %c0_41 = arith.constant 0 : index
    %67 = vector.load %arg1[%c8_40, %c0_41] : memref<64x64xf32, #tpu.memory_space<vmem>>, vector<8x64xf32>
    %68 = arith.subf %66, %46 : vector<8x64xf32>
    %69 = arith.mulf %67, %68 : vector<8x64xf32>
    %70 = arith.addf %46, %69 : vector<8x64xf32>
    %c0_42 = arith.constant 0 : index
    %c0_43 = arith.constant 0 : index
    %71 = vector.load %arg9[%c0_42, %c0_43] : memref<8x64xf32, #tpu.memory_space<vmem>>, vector<8x64xf32>
    tpu.vector_store %arg9[%c0_42, %c0_43], %70 {strides = array<i32>} : memref<8x64xf32, #tpu.memory_space<vmem>>, vector<8x64xf32>,
    %72 = arith.subf %64, %47 : vector<8x64xf32>
    %73 = arith.mulf %67, %72 : vector<8x64xf32>
    %74 = arith.addf %47, %73 : vector<8x64xf32>
    %c0_44 = arith.constant 0 : index
    %c0_45 = arith.constant 0 : index
    %75 = vector.load %arg10[%c0_44, %c0_45] : memref<8x64xf32, #tpu.memory_space<vmem>>, vector<8x64xf32>
    tpu.vector_store %arg10[%c0_44, %c0_45], %74 {strides = array<i32>} : memref<8x64xf32, #tpu.memory_space<vmem>>, vector<8x64xf32>,
    %76 = arith.mulf %67, %66 : vector<8x64xf32>
    %77 = vector.extract_strided_slice %76 {offsets = [0, 0], sizes = [8, 32], strides = [1, 1]} : vector<8x64xf32> to vector<8x32xf32>
    %c8_46 = arith.constant 8 : index
    %c0_47 = arith.constant 0 : index
    %78 = vector.load %arg11[%c8_46, %c0_47] : memref<64x64xf32, #tpu.memory_space<vmem>>, vector<8x32xf32>
    tpu.vector_store %arg11[%c8_46, %c0_47], %77 {strides = array<i32>} : memref<64x64xf32, #tpu.memory_space<vmem>>, vector<8x32xf32>,
    %79 = vector.extract_strided_slice %76 {offsets = [0, 32], sizes = [8, 32], strides = [1, 1]} : vector<8x64xf32> to vector<8x32xf32>
    %c48 = arith.constant 48 : index
    %c32_48 = arith.constant 32 : index
    %80 = vector.load %arg11[%c48, %c32_48] : memref<64x64xf32, #tpu.memory_space<vmem>>, vector<8x32xf32>
    tpu.vector_store %arg11[%c48, %c32_48], %79 {strides = array<i32>} : memref<64x64xf32, #tpu.memory_space<vmem>>, vector<8x32xf32>,
    %c0_49 = arith.constant 0 : index
    %c0_50 = arith.constant 0 : index
    %81 = vector.load %arg9[%c0_49, %c0_50] : memref<8x64xf32, #tpu.memory_space<vmem>>, vector<8x64xf32>
    %c0_51 = arith.constant 0 : index
    %c0_52 = arith.constant 0 : index
    %82 = vector.load %arg10[%c0_51, %c0_52] : memref<8x64xf32, #tpu.memory_space<vmem>>, vector<8x64xf32>
    %c16 = arith.constant 16 : index
    %c0_53 = arith.constant 0 : index
    %83 = vector.load %arg8[%c16, %c0_53] : memref<64x256xf32, #tpu.memory_space<vmem>>, vector<8x256xf32>
    %c0_54 = arith.constant 0 : index
    %c0_55 = arith.constant 0 : index
    %84 = vector.load %arg3[%c0_54, %c0_55] : memref<64x256xf32, #tpu.memory_space<vmem>>, vector<64x256xf32>
    %cst_56 = arith.constant dense<0.000000e+00> : vector<8x256xf32>
    %85 = tpu.matmul %81, %84, %cst_56 {dimension_numbers = #tpu.dot_dimension_numbers<[1], [0], [0], [1], [0, 0, 1, 1], [], []>} : vector<8x64xf32>, vector<64x256xf32>, vector<8x256xf32> -> vector<8x256xf32>
    %86 = arith.addf %83, %85 : vector<8x256xf32>
    %87 = arith.negf %86 : vector<8x256xf32>
    %88 = math.exp %87 : vector<8x256xf32>
    %cst_57 = arith.constant 1.000000e+00 : f32
    %89 = vector.broadcast %cst_57 : f32 to vector<8x256xf32>
    %90 = arith.addf %89, %88 : vector<8x256xf32>
    %91 = arith.divf %89, %90 : vector<8x256xf32>
    %92 = vector.extract_strided_slice %91 {offsets = [0, 0], sizes = [8, 64], strides = [1, 1]} : vector<8x256xf32> to vector<8x64xf32>
    %93 = vector.extract_strided_slice %91 {offsets = [0, 64], sizes = [8, 64], strides = [1, 1]} : vector<8x256xf32> to vector<8x64xf32>
    %94 = vector.extract_strided_slice %86 {offsets = [0, 128], sizes = [8, 64], strides = [1, 1]} : vector<8x256xf32> to vector<8x64xf32>
    %95 = math.tanh %94 : vector<8x64xf32>
    %96 = vector.extract_strided_slice %91 {offsets = [0, 192], sizes = [8, 64], strides = [1, 1]} : vector<8x256xf32> to vector<8x64xf32>
    %97 = arith.mulf %93, %82 : vector<8x64xf32>
    %98 = arith.mulf %92, %95 : vector<8x64xf32>
    %99 = arith.addf %97, %98 : vector<8x64xf32>
    %100 = math.tanh %99 : vector<8x64xf32>
    %101 = arith.mulf %96, %100 : vector<8x64xf32>
    %c16_58 = arith.constant 16 : index
    %c0_59 = arith.constant 0 : index
    %102 = vector.load %arg1[%c16_58, %c0_59] : memref<64x64xf32, #tpu.memory_space<vmem>>, vector<8x64xf32>
    %103 = arith.subf %101, %81 : vector<8x64xf32>
    %104 = arith.mulf %102, %103 : vector<8x64xf32>
    %105 = arith.addf %81, %104 : vector<8x64xf32>
    %c0_60 = arith.constant 0 : index
    %c0_61 = arith.constant 0 : index
    %106 = vector.load %arg9[%c0_60, %c0_61] : memref<8x64xf32, #tpu.memory_space<vmem>>, vector<8x64xf32>
    tpu.vector_store %arg9[%c0_60, %c0_61], %105 {strides = array<i32>} : memref<8x64xf32, #tpu.memory_space<vmem>>, vector<8x64xf32>,
    %107 = arith.subf %99, %82 : vector<8x64xf32>
    %108 = arith.mulf %102, %107 : vector<8x64xf32>
    %109 = arith.addf %82, %108 : vector<8x64xf32>
    %c0_62 = arith.constant 0 : index
    %c0_63 = arith.constant 0 : index
    %110 = vector.load %arg10[%c0_62, %c0_63] : memref<8x64xf32, #tpu.memory_space<vmem>>, vector<8x64xf32>
    tpu.vector_store %arg10[%c0_62, %c0_63], %109 {strides = array<i32>} : memref<8x64xf32, #tpu.memory_space<vmem>>, vector<8x64xf32>,
    %111 = arith.mulf %102, %101 : vector<8x64xf32>
    %112 = vector.extract_strided_slice %111 {offsets = [0, 0], sizes = [8, 32], strides = [1, 1]} : vector<8x64xf32> to vector<8x32xf32>
    %c16_64 = arith.constant 16 : index
    %c0_65 = arith.constant 0 : index
    %113 = vector.load %arg11[%c16_64, %c0_65] : memref<64x64xf32, #tpu.memory_space<vmem>>, vector<8x32xf32>
    tpu.vector_store %arg11[%c16_64, %c0_65], %112 {strides = array<i32>} : memref<64x64xf32, #tpu.memory_space<vmem>>, vector<8x32xf32>,
    %114 = vector.extract_strided_slice %111 {offsets = [0, 32], sizes = [8, 32], strides = [1, 1]} : vector<8x64xf32> to vector<8x32xf32>
    %c40 = arith.constant 40 : index
    %c32_66 = arith.constant 32 : index
    %115 = vector.load %arg11[%c40, %c32_66] : memref<64x64xf32, #tpu.memory_space<vmem>>, vector<8x32xf32>
    tpu.vector_store %arg11[%c40, %c32_66], %114 {strides = array<i32>} : memref<64x64xf32, #tpu.memory_space<vmem>>, vector<8x32xf32>,
    %c0_67 = arith.constant 0 : index
    %c0_68 = arith.constant 0 : index
    %116 = vector.load %arg9[%c0_67, %c0_68] : memref<8x64xf32, #tpu.memory_space<vmem>>, vector<8x64xf32>
    %c0_69 = arith.constant 0 : index
    %c0_70 = arith.constant 0 : index
    %117 = vector.load %arg10[%c0_69, %c0_70] : memref<8x64xf32, #tpu.memory_space<vmem>>, vector<8x64xf32>
    %c24 = arith.constant 24 : index
    %c0_71 = arith.constant 0 : index
    %118 = vector.load %arg8[%c24, %c0_71] : memref<64x256xf32, #tpu.memory_space<vmem>>, vector<8x256xf32>
    %c0_72 = arith.constant 0 : index
    %c0_73 = arith.constant 0 : index
    %119 = vector.load %arg3[%c0_72, %c0_73] : memref<64x256xf32, #tpu.memory_space<vmem>>, vector<64x256xf32>
    %cst_74 = arith.constant dense<0.000000e+00> : vector<8x256xf32>
    %120 = tpu.matmul %116, %119, %cst_74 {dimension_numbers = #tpu.dot_dimension_numbers<[1], [0], [0], [1], [0, 0, 1, 1], [], []>} : vector<8x64xf32>, vector<64x256xf32>, vector<8x256xf32> -> vector<8x256xf32>
    %121 = arith.addf %118, %120 : vector<8x256xf32>
    %122 = arith.negf %121 : vector<8x256xf32>
    %123 = math.exp %122 : vector<8x256xf32>
    %cst_75 = arith.constant 1.000000e+00 : f32
    %124 = vector.broadcast %cst_75 : f32 to vector<8x256xf32>
    %125 = arith.addf %124, %123 : vector<8x256xf32>
    %126 = arith.divf %124, %125 : vector<8x256xf32>
    %127 = vector.extract_strided_slice %126 {offsets = [0, 0], sizes = [8, 64], strides = [1, 1]} : vector<8x256xf32> to vector<8x64xf32>
    %128 = vector.extract_strided_slice %126 {offsets = [0, 64], sizes = [8, 64], strides = [1, 1]} : vector<8x256xf32> to vector<8x64xf32>
    %129 = vector.extract_strided_slice %121 {offsets = [0, 128], sizes = [8, 64], strides = [1, 1]} : vector<8x256xf32> to vector<8x64xf32>
    %130 = math.tanh %129 : vector<8x64xf32>
    %131 = vector.extract_strided_slice %126 {offsets = [0, 192], sizes = [8, 64], strides = [1, 1]} : vector<8x256xf32> to vector<8x64xf32>
    %132 = arith.mulf %128, %117 : vector<8x64xf32>
    %133 = arith.mulf %127, %130 : vector<8x64xf32>
    %134 = arith.addf %132, %133 : vector<8x64xf32>
    %135 = math.tanh %134 : vector<8x64xf32>
    %136 = arith.mulf %131, %135 : vector<8x64xf32>
    %c24_76 = arith.constant 24 : index
    %c0_77 = arith.constant 0 : index
    %137 = vector.load %arg1[%c24_76, %c0_77] : memref<64x64xf32, #tpu.memory_space<vmem>>, vector<8x64xf32>
    %138 = arith.subf %136, %116 : vector<8x64xf32>
    %139 = arith.mulf %137, %138 : vector<8x64xf32>
    %140 = arith.addf %116, %139 : vector<8x64xf32>
    %c0_78 = arith.constant 0 : index
    %c0_79 = arith.constant 0 : index
    %141 = vector.load %arg9[%c0_78, %c0_79] : memref<8x64xf32, #tpu.memory_space<vmem>>, vector<8x64xf32>
    tpu.vector_store %arg9[%c0_78, %c0_79], %140 {strides = array<i32>} : memref<8x64xf32, #tpu.memory_space<vmem>>, vector<8x64xf32>,
    %142 = arith.subf %134, %117 : vector<8x64xf32>
    %143 = arith.mulf %137, %142 : vector<8x64xf32>
    %144 = arith.addf %117, %143 : vector<8x64xf32>
    %c0_80 = arith.constant 0 : index
    %c0_81 = arith.constant 0 : index
    %145 = vector.load %arg10[%c0_80, %c0_81] : memref<8x64xf32, #tpu.memory_space<vmem>>, vector<8x64xf32>
    tpu.vector_store %arg10[%c0_80, %c0_81], %144 {strides = array<i32>} : memref<8x64xf32, #tpu.memory_space<vmem>>, vector<8x64xf32>,
    %146 = arith.mulf %137, %136 : vector<8x64xf32>
    %147 = vector.extract_strided_slice %146 {offsets = [0, 0], sizes = [8, 32], strides = [1, 1]} : vector<8x64xf32> to vector<8x32xf32>
    %c24_82 = arith.constant 24 : index
    %c0_83 = arith.constant 0 : index
    %148 = vector.load %arg11[%c24_82, %c0_83] : memref<64x64xf32, #tpu.memory_space<vmem>>, vector<8x32xf32>
    tpu.vector_store %arg11[%c24_82, %c0_83], %147 {strides = array<i32>} : memref<64x64xf32, #tpu.memory_space<vmem>>, vector<8x32xf32>,
    %149 = vector.extract_strided_slice %146 {offsets = [0, 32], sizes = [8, 32], strides = [1, 1]} : vector<8x64xf32> to vector<8x32xf32>
    %c32_84 = arith.constant 32 : index
    %c32_85 = arith.constant 32 : index
    %150 = vector.load %arg11[%c32_84, %c32_85] : memref<64x64xf32, #tpu.memory_space<vmem>>, vector<8x32xf32>
    tpu.vector_store %arg11[%c32_84, %c32_85], %149 {strides = array<i32>} : memref<64x64xf32, #tpu.memory_space<vmem>>, vector<8x32xf32>,
    %c0_86 = arith.constant 0 : index
    %c0_87 = arith.constant 0 : index
    %151 = vector.load %arg9[%c0_86, %c0_87] : memref<8x64xf32, #tpu.memory_space<vmem>>, vector<8x64xf32>
    %c0_88 = arith.constant 0 : index
    %c0_89 = arith.constant 0 : index
    %152 = vector.load %arg10[%c0_88, %c0_89] : memref<8x64xf32, #tpu.memory_space<vmem>>, vector<8x64xf32>
    %c32_90 = arith.constant 32 : index
    %c0_91 = arith.constant 0 : index
    %153 = vector.load %arg8[%c32_90, %c0_91] : memref<64x256xf32, #tpu.memory_space<vmem>>, vector<8x256xf32>
    %c0_92 = arith.constant 0 : index
    %c0_93 = arith.constant 0 : index
    %154 = vector.load %arg3[%c0_92, %c0_93] : memref<64x256xf32, #tpu.memory_space<vmem>>, vector<64x256xf32>
    %cst_94 = arith.constant dense<0.000000e+00> : vector<8x256xf32>
    %155 = tpu.matmul %151, %154, %cst_94 {dimension_numbers = #tpu.dot_dimension_numbers<[1], [0], [0], [1], [0, 0, 1, 1], [], []>} : vector<8x64xf32>, vector<64x256xf32>, vector<8x256xf32> -> vector<8x256xf32>
    %156 = arith.addf %153, %155 : vector<8x256xf32>
    %157 = arith.negf %156 : vector<8x256xf32>
    %158 = math.exp %157 : vector<8x256xf32>
    %cst_95 = arith.constant 1.000000e+00 : f32
    %159 = vector.broadcast %cst_95 : f32 to vector<8x256xf32>
    %160 = arith.addf %159, %158 : vector<8x256xf32>
    %161 = arith.divf %159, %160 : vector<8x256xf32>
    %162 = vector.extract_strided_slice %161 {offsets = [0, 0], sizes = [8, 64], strides = [1, 1]} : vector<8x256xf32> to vector<8x64xf32>
    %163 = vector.extract_strided_slice %161 {offsets = [0, 64], sizes = [8, 64], strides = [1, 1]} : vector<8x256xf32> to vector<8x64xf32>
    %164 = vector.extract_strided_slice %156 {offsets = [0, 128], sizes = [8, 64], strides = [1, 1]} : vector<8x256xf32> to vector<8x64xf32>
    %165 = math.tanh %164 : vector<8x64xf32>
    %166 = vector.extract_strided_slice %161 {offsets = [0, 192], sizes = [8, 64], strides = [1, 1]} : vector<8x256xf32> to vector<8x64xf32>
    %167 = arith.mulf %163, %152 : vector<8x64xf32>
    %168 = arith.mulf %162, %165 : vector<8x64xf32>
    %169 = arith.addf %167, %168 : vector<8x64xf32>
    %170 = math.tanh %169 : vector<8x64xf32>
    %171 = arith.mulf %166, %170 : vector<8x64xf32>
    %c32_96 = arith.constant 32 : index
    %c0_97 = arith.constant 0 : index
    %172 = vector.load %arg1[%c32_96, %c0_97] : memref<64x64xf32, #tpu.memory_space<vmem>>, vector<8x64xf32>
    %173 = arith.subf %171, %151 : vector<8x64xf32>
    %174 = arith.mulf %172, %173 : vector<8x64xf32>
    %175 = arith.addf %151, %174 : vector<8x64xf32>
    %c0_98 = arith.constant 0 : index
    %c0_99 = arith.constant 0 : index
    %176 = vector.load %arg9[%c0_98, %c0_99] : memref<8x64xf32, #tpu.memory_space<vmem>>, vector<8x64xf32>
    tpu.vector_store %arg9[%c0_98, %c0_99], %175 {strides = array<i32>} : memref<8x64xf32, #tpu.memory_space<vmem>>, vector<8x64xf32>,
    %177 = arith.subf %169, %152 : vector<8x64xf32>
    %178 = arith.mulf %172, %177 : vector<8x64xf32>
    %179 = arith.addf %152, %178 : vector<8x64xf32>
    %c0_100 = arith.constant 0 : index
    %c0_101 = arith.constant 0 : index
    %180 = vector.load %arg10[%c0_100, %c0_101] : memref<8x64xf32, #tpu.memory_space<vmem>>, vector<8x64xf32>
    tpu.vector_store %arg10[%c0_100, %c0_101], %179 {strides = array<i32>} : memref<8x64xf32, #tpu.memory_space<vmem>>, vector<8x64xf32>,
    %181 = arith.mulf %172, %171 : vector<8x64xf32>
    %182 = vector.extract_strided_slice %181 {offsets = [0, 0], sizes = [8, 32], strides = [1, 1]} : vector<8x64xf32> to vector<8x32xf32>
    %c32_102 = arith.constant 32 : index
    %c0_103 = arith.constant 0 : index
    %183 = vector.load %arg11[%c32_102, %c0_103] : memref<64x64xf32, #tpu.memory_space<vmem>>, vector<8x32xf32>
    tpu.vector_store %arg11[%c32_102, %c0_103], %182 {strides = array<i32>} : memref<64x64xf32, #tpu.memory_space<vmem>>, vector<8x32xf32>,
    %184 = vector.extract_strided_slice %181 {offsets = [0, 32], sizes = [8, 32], strides = [1, 1]} : vector<8x64xf32> to vector<8x32xf32>
    %c24_104 = arith.constant 24 : index
    %c32_105 = arith.constant 32 : index
    %185 = vector.load %arg11[%c24_104, %c32_105] : memref<64x64xf32, #tpu.memory_space<vmem>>, vector<8x32xf32>
    tpu.vector_store %arg11[%c24_104, %c32_105], %184 {strides = array<i32>} : memref<64x64xf32, #tpu.memory_space<vmem>>, vector<8x32xf32>,
    %c0_106 = arith.constant 0 : index
    %c0_107 = arith.constant 0 : index
    %186 = vector.load %arg9[%c0_106, %c0_107] : memref<8x64xf32, #tpu.memory_space<vmem>>, vector<8x64xf32>
    %c0_108 = arith.constant 0 : index
    %c0_109 = arith.constant 0 : index
    %187 = vector.load %arg10[%c0_108, %c0_109] : memref<8x64xf32, #tpu.memory_space<vmem>>, vector<8x64xf32>
    %c40_110 = arith.constant 40 : index
    %c0_111 = arith.constant 0 : index
    %188 = vector.load %arg8[%c40_110, %c0_111] : memref<64x256xf32, #tpu.memory_space<vmem>>, vector<8x256xf32>
    %c0_112 = arith.constant 0 : index
    %c0_113 = arith.constant 0 : index
    %189 = vector.load %arg3[%c0_112, %c0_113] : memref<64x256xf32, #tpu.memory_space<vmem>>, vector<64x256xf32>
    %cst_114 = arith.constant dense<0.000000e+00> : vector<8x256xf32>
    %190 = tpu.matmul %186, %189, %cst_114 {dimension_numbers = #tpu.dot_dimension_numbers<[1], [0], [0], [1], [0, 0, 1, 1], [], []>} : vector<8x64xf32>, vector<64x256xf32>, vector<8x256xf32> -> vector<8x256xf32>
    %191 = arith.addf %188, %190 : vector<8x256xf32>
    %192 = arith.negf %191 : vector<8x256xf32>
    %193 = math.exp %192 : vector<8x256xf32>
    %cst_115 = arith.constant 1.000000e+00 : f32
    %194 = vector.broadcast %cst_115 : f32 to vector<8x256xf32>
    %195 = arith.addf %194, %193 : vector<8x256xf32>
    %196 = arith.divf %194, %195 : vector<8x256xf32>
    %197 = vector.extract_strided_slice %196 {offsets = [0, 0], sizes = [8, 64], strides = [1, 1]} : vector<8x256xf32> to vector<8x64xf32>
    %198 = vector.extract_strided_slice %196 {offsets = [0, 64], sizes = [8, 64], strides = [1, 1]} : vector<8x256xf32> to vector<8x64xf32>
    %199 = vector.extract_strided_slice %191 {offsets = [0, 128], sizes = [8, 64], strides = [1, 1]} : vector<8x256xf32> to vector<8x64xf32>
    %200 = math.tanh %199 : vector<8x64xf32>
    %201 = vector.extract_strided_slice %196 {offsets = [0, 192], sizes = [8, 64], strides = [1, 1]} : vector<8x256xf32> to vector<8x64xf32>
    %202 = arith.mulf %198, %187 : vector<8x64xf32>
    %203 = arith.mulf %197, %200 : vector<8x64xf32>
    %204 = arith.addf %202, %203 : vector<8x64xf32>
    %205 = math.tanh %204 : vector<8x64xf32>
    %206 = arith.mulf %201, %205 : vector<8x64xf32>
    %c40_116 = arith.constant 40 : index
    %c0_117 = arith.constant 0 : index
    %207 = vector.load %arg1[%c40_116, %c0_117] : memref<64x64xf32, #tpu.memory_space<vmem>>, vector<8x64xf32>
    %208 = arith.subf %206, %186 : vector<8x64xf32>
    %209 = arith.mulf %207, %208 : vector<8x64xf32>
    %210 = arith.addf %186, %209 : vector<8x64xf32>
    %c0_118 = arith.constant 0 : index
    %c0_119 = arith.constant 0 : index
    %211 = vector.load %arg9[%c0_118, %c0_119] : memref<8x64xf32, #tpu.memory_space<vmem>>, vector<8x64xf32>
    tpu.vector_store %arg9[%c0_118, %c0_119], %210 {strides = array<i32>} : memref<8x64xf32, #tpu.memory_space<vmem>>, vector<8x64xf32>,
    %212 = arith.subf %204, %187 : vector<8x64xf32>
    %213 = arith.mulf %207, %212 : vector<8x64xf32>
    %214 = arith.addf %187, %213 : vector<8x64xf32>
    %c0_120 = arith.constant 0 : index
    %c0_121 = arith.constant 0 : index
    %215 = vector.load %arg10[%c0_120, %c0_121] : memref<8x64xf32, #tpu.memory_space<vmem>>, vector<8x64xf32>
    tpu.vector_store %arg10[%c0_120, %c0_121], %214 {strides = array<i32>} : memref<8x64xf32, #tpu.memory_space<vmem>>, vector<8x64xf32>,
    %216 = arith.mulf %207, %206 : vector<8x64xf32>
    %217 = vector.extract_strided_slice %216 {offsets = [0, 0], sizes = [8, 32], strides = [1, 1]} : vector<8x64xf32> to vector<8x32xf32>
    %c40_122 = arith.constant 40 : index
    %c0_123 = arith.constant 0 : index
    %218 = vector.load %arg11[%c40_122, %c0_123] : memref<64x64xf32, #tpu.memory_space<vmem>>, vector<8x32xf32>
    tpu.vector_store %arg11[%c40_122, %c0_123], %217 {strides = array<i32>} : memref<64x64xf32, #tpu.memory_space<vmem>>, vector<8x32xf32>,
    %219 = vector.extract_strided_slice %216 {offsets = [0, 32], sizes = [8, 32], strides = [1, 1]} : vector<8x64xf32> to vector<8x32xf32>
    %c16_124 = arith.constant 16 : index
    %c32_125 = arith.constant 32 : index
    %220 = vector.load %arg11[%c16_124, %c32_125] : memref<64x64xf32, #tpu.memory_space<vmem>>, vector<8x32xf32>
    tpu.vector_store %arg11[%c16_124, %c32_125], %219 {strides = array<i32>} : memref<64x64xf32, #tpu.memory_space<vmem>>, vector<8x32xf32>,
    %c0_126 = arith.constant 0 : index
    %c0_127 = arith.constant 0 : index
    %221 = vector.load %arg9[%c0_126, %c0_127] : memref<8x64xf32, #tpu.memory_space<vmem>>, vector<8x64xf32>
    %c0_128 = arith.constant 0 : index
    %c0_129 = arith.constant 0 : index
    %222 = vector.load %arg10[%c0_128, %c0_129] : memref<8x64xf32, #tpu.memory_space<vmem>>, vector<8x64xf32>
    %c48_130 = arith.constant 48 : index
    %c0_131 = arith.constant 0 : index
    %223 = vector.load %arg8[%c48_130, %c0_131] : memref<64x256xf32, #tpu.memory_space<vmem>>, vector<8x256xf32>
    %c0_132 = arith.constant 0 : index
    %c0_133 = arith.constant 0 : index
    %224 = vector.load %arg3[%c0_132, %c0_133] : memref<64x256xf32, #tpu.memory_space<vmem>>, vector<64x256xf32>
    %cst_134 = arith.constant dense<0.000000e+00> : vector<8x256xf32>
    %225 = tpu.matmul %221, %224, %cst_134 {dimension_numbers = #tpu.dot_dimension_numbers<[1], [0], [0], [1], [0, 0, 1, 1], [], []>} : vector<8x64xf32>, vector<64x256xf32>, vector<8x256xf32> -> vector<8x256xf32>
    %226 = arith.addf %223, %225 : vector<8x256xf32>
    %227 = arith.negf %226 : vector<8x256xf32>
    %228 = math.exp %227 : vector<8x256xf32>
    %cst_135 = arith.constant 1.000000e+00 : f32
    %229 = vector.broadcast %cst_135 : f32 to vector<8x256xf32>
    %230 = arith.addf %229, %228 : vector<8x256xf32>
    %231 = arith.divf %229, %230 : vector<8x256xf32>
    %232 = vector.extract_strided_slice %231 {offsets = [0, 0], sizes = [8, 64], strides = [1, 1]} : vector<8x256xf32> to vector<8x64xf32>
    %233 = vector.extract_strided_slice %231 {offsets = [0, 64], sizes = [8, 64], strides = [1, 1]} : vector<8x256xf32> to vector<8x64xf32>
    %234 = vector.extract_strided_slice %226 {offsets = [0, 128], sizes = [8, 64], strides = [1, 1]} : vector<8x256xf32> to vector<8x64xf32>
    %235 = math.tanh %234 : vector<8x64xf32>
    %236 = vector.extract_strided_slice %231 {offsets = [0, 192], sizes = [8, 64], strides = [1, 1]} : vector<8x256xf32> to vector<8x64xf32>
    %237 = arith.mulf %233, %222 : vector<8x64xf32>
    %238 = arith.mulf %232, %235 : vector<8x64xf32>
    %239 = arith.addf %237, %238 : vector<8x64xf32>
    %240 = math.tanh %239 : vector<8x64xf32>
    %241 = arith.mulf %236, %240 : vector<8x64xf32>
    %c48_136 = arith.constant 48 : index
    %c0_137 = arith.constant 0 : index
    %242 = vector.load %arg1[%c48_136, %c0_137] : memref<64x64xf32, #tpu.memory_space<vmem>>, vector<8x64xf32>
    %243 = arith.subf %241, %221 : vector<8x64xf32>
    %244 = arith.mulf %242, %243 : vector<8x64xf32>
    %245 = arith.addf %221, %244 : vector<8x64xf32>
    %c0_138 = arith.constant 0 : index
    %c0_139 = arith.constant 0 : index
    %246 = vector.load %arg9[%c0_138, %c0_139] : memref<8x64xf32, #tpu.memory_space<vmem>>, vector<8x64xf32>
    tpu.vector_store %arg9[%c0_138, %c0_139], %245 {strides = array<i32>} : memref<8x64xf32, #tpu.memory_space<vmem>>, vector<8x64xf32>,
    %247 = arith.subf %239, %222 : vector<8x64xf32>
    %248 = arith.mulf %242, %247 : vector<8x64xf32>
    %249 = arith.addf %222, %248 : vector<8x64xf32>
    %c0_140 = arith.constant 0 : index
    %c0_141 = arith.constant 0 : index
    %250 = vector.load %arg10[%c0_140, %c0_141] : memref<8x64xf32, #tpu.memory_space<vmem>>, vector<8x64xf32>
    tpu.vector_store %arg10[%c0_140, %c0_141], %249 {strides = array<i32>} : memref<8x64xf32, #tpu.memory_space<vmem>>, vector<8x64xf32>,
    %251 = arith.mulf %242, %241 : vector<8x64xf32>
    %252 = vector.extract_strided_slice %251 {offsets = [0, 0], sizes = [8, 32], strides = [1, 1]} : vector<8x64xf32> to vector<8x32xf32>
    %c48_142 = arith.constant 48 : index
    %c0_143 = arith.constant 0 : index
    %253 = vector.load %arg11[%c48_142, %c0_143] : memref<64x64xf32, #tpu.memory_space<vmem>>, vector<8x32xf32>
    tpu.vector_store %arg11[%c48_142, %c0_143], %252 {strides = array<i32>} : memref<64x64xf32, #tpu.memory_space<vmem>>, vector<8x32xf32>,
    %254 = vector.extract_strided_slice %251 {offsets = [0, 32], sizes = [8, 32], strides = [1, 1]} : vector<8x64xf32> to vector<8x32xf32>
    %c8_144 = arith.constant 8 : index
    %c32_145 = arith.constant 32 : index
    %255 = vector.load %arg11[%c8_144, %c32_145] : memref<64x64xf32, #tpu.memory_space<vmem>>, vector<8x32xf32>
    tpu.vector_store %arg11[%c8_144, %c32_145], %254 {strides = array<i32>} : memref<64x64xf32, #tpu.memory_space<vmem>>, vector<8x32xf32>,
    %c0_146 = arith.constant 0 : index
    %c0_147 = arith.constant 0 : index
    %256 = vector.load %arg9[%c0_146, %c0_147] : memref<8x64xf32, #tpu.memory_space<vmem>>, vector<8x64xf32>
    %c0_148 = arith.constant 0 : index
    %c0_149 = arith.constant 0 : index
    %257 = vector.load %arg10[%c0_148, %c0_149] : memref<8x64xf32, #tpu.memory_space<vmem>>, vector<8x64xf32>
    %c56_150 = arith.constant 56 : index
    %c0_151 = arith.constant 0 : index
    %258 = vector.load %arg8[%c56_150, %c0_151] : memref<64x256xf32, #tpu.memory_space<vmem>>, vector<8x256xf32>
    %c0_152 = arith.constant 0 : index
    %c0_153 = arith.constant 0 : index
    %259 = vector.load %arg3[%c0_152, %c0_153] : memref<64x256xf32, #tpu.memory_space<vmem>>, vector<64x256xf32>
    %cst_154 = arith.constant dense<0.000000e+00> : vector<8x256xf32>
    %260 = tpu.matmul %256, %259, %cst_154 {dimension_numbers = #tpu.dot_dimension_numbers<[1], [0], [0], [1], [0, 0, 1, 1], [], []>} : vector<8x64xf32>, vector<64x256xf32>, vector<8x256xf32> -> vector<8x256xf32>
    %261 = arith.addf %258, %260 : vector<8x256xf32>
    %262 = arith.negf %261 : vector<8x256xf32>
    %263 = math.exp %262 : vector<8x256xf32>
    %cst_155 = arith.constant 1.000000e+00 : f32
    %264 = vector.broadcast %cst_155 : f32 to vector<8x256xf32>
    %265 = arith.addf %264, %263 : vector<8x256xf32>
    %266 = arith.divf %264, %265 : vector<8x256xf32>
    %267 = vector.extract_strided_slice %266 {offsets = [0, 0], sizes = [8, 64], strides = [1, 1]} : vector<8x256xf32> to vector<8x64xf32>
    %268 = vector.extract_strided_slice %266 {offsets = [0, 64], sizes = [8, 64], strides = [1, 1]} : vector<8x256xf32> to vector<8x64xf32>
    %269 = vector.extract_strided_slice %261 {offsets = [0, 128], sizes = [8, 64], strides = [1, 1]} : vector<8x256xf32> to vector<8x64xf32>
    %270 = math.tanh %269 : vector<8x64xf32>
    %271 = vector.extract_strided_slice %266 {offsets = [0, 192], sizes = [8, 64], strides = [1, 1]} : vector<8x256xf32> to vector<8x64xf32>
    %272 = arith.mulf %268, %257 : vector<8x64xf32>
    %273 = arith.mulf %267, %270 : vector<8x64xf32>
    %274 = arith.addf %272, %273 : vector<8x64xf32>
    %275 = math.tanh %274 : vector<8x64xf32>
    %276 = arith.mulf %271, %275 : vector<8x64xf32>
    %c56_156 = arith.constant 56 : index
    %c0_157 = arith.constant 0 : index
    %277 = vector.load %arg1[%c56_156, %c0_157] : memref<64x64xf32, #tpu.memory_space<vmem>>, vector<8x64xf32>
    %278 = arith.subf %276, %256 : vector<8x64xf32>
    %279 = arith.mulf %277, %278 : vector<8x64xf32>
    %280 = arith.addf %256, %279 : vector<8x64xf32>
    %c0_158 = arith.constant 0 : index
    %c0_159 = arith.constant 0 : index
    %281 = vector.load %arg9[%c0_158, %c0_159] : memref<8x64xf32, #tpu.memory_space<vmem>>, vector<8x64xf32>
    tpu.vector_store %arg9[%c0_158, %c0_159], %280 {strides = array<i32>} : memref<8x64xf32, #tpu.memory_space<vmem>>, vector<8x64xf32>,
    %282 = arith.subf %274, %257 : vector<8x64xf32>
    %283 = arith.mulf %277, %282 : vector<8x64xf32>
    %284 = arith.addf %257, %283 : vector<8x64xf32>
    %c0_160 = arith.constant 0 : index
    %c0_161 = arith.constant 0 : index
    %285 = vector.load %arg10[%c0_160, %c0_161] : memref<8x64xf32, #tpu.memory_space<vmem>>, vector<8x64xf32>
    tpu.vector_store %arg10[%c0_160, %c0_161], %284 {strides = array<i32>} : memref<8x64xf32, #tpu.memory_space<vmem>>, vector<8x64xf32>,
    %286 = arith.mulf %277, %276 : vector<8x64xf32>
    %287 = vector.extract_strided_slice %286 {offsets = [0, 0], sizes = [8, 32], strides = [1, 1]} : vector<8x64xf32> to vector<8x32xf32>
    %c56_162 = arith.constant 56 : index
    %c0_163 = arith.constant 0 : index
    %288 = vector.load %arg11[%c56_162, %c0_163] : memref<64x64xf32, #tpu.memory_space<vmem>>, vector<8x32xf32>
    tpu.vector_store %arg11[%c56_162, %c0_163], %287 {strides = array<i32>} : memref<64x64xf32, #tpu.memory_space<vmem>>, vector<8x32xf32>,
    %289 = vector.extract_strided_slice %286 {offsets = [0, 32], sizes = [8, 32], strides = [1, 1]} : vector<8x64xf32> to vector<8x32xf32>
    %c0_164 = arith.constant 0 : index
    %c32_165 = arith.constant 32 : index
    %290 = vector.load %arg11[%c0_164, %c32_165] : memref<64x64xf32, #tpu.memory_space<vmem>>, vector<8x32xf32>
    tpu.vector_store %arg11[%c0_164, %c32_165], %289 {strides = array<i32>} : memref<64x64xf32, #tpu.memory_space<vmem>>, vector<8x32xf32>,
    %c0_166 = arith.constant 0 : index
    %c0_167 = arith.constant 0 : index
    %291 = vector.load %arg11[%c0_166, %c0_167] : memref<64x64xf32, #tpu.memory_space<vmem>>, vector<64x64xf32>
    %c0_168 = arith.constant 0 : index
    %c0_169 = arith.constant 0 : index
    %292 = vector.load %arg5[%c0_168, %c0_169] : memref<64x128xf32, #tpu.memory_space<vmem>>, vector<64x128xf32>
    %cst_170 = arith.constant dense<0.000000e+00> : vector<64x128xf32>
    %293 = tpu.matmul %291, %292, %cst_170 {dimension_numbers = #tpu.dot_dimension_numbers<[1], [0], [0], [1], [0, 0, 1, 1], [], []>} : vector<64x64xf32>, vector<64x128xf32>, vector<64x128xf32> -> vector<64x128xf32>
    %c0_171 = arith.constant 0 : index
    %c0_172 = arith.constant 0 : index
    %294 = vector.load %arg6[%c0_171, %c0_172] : memref<1x128xf32, #tpu.memory_space<vmem>>, vector<1x128xf32>
    %295 = vector.broadcast %294 : vector<1x128xf32> to vector<64x128xf32>
    %296 = arith.addf %293, %295 : vector<64x128xf32>
    %c0_173 = arith.constant 0 : index
    %c0_174 = arith.constant 0 : index
    %297 = vector.load %arg7[%c0_173, %c0_174] : memref<64x128xf32, #tpu.memory_space<vmem>>, vector<64x128xf32>
    tpu.vector_store %arg7[%c0_173, %c0_174], %296 {strides = array<i32>} : memref<64x128xf32, #tpu.memory_space<vmem>>, vector<64x128xf32>,
    return
  }
}

</mosaic_0001>

<bundles_post_ra>
// kernel: tpu_custom_call.1
= control target key start
LH: loop header
LB: loop body
LE: loop exit
PB: predicated region body
PF: predicated region fallthrough
CT: control target
= control target key end

     0   :  { %12 = vsyncpa [#allocation7], 0  ;;  %s2600_s0 = inlined_call_operand.vmem [shape: f32[64,32], index: 0, kind: input, shape index: {}]   ;;  %s2601_s1 = inlined_call_operand.vmem [shape: f32[64,64], index: 1, kind: input, shape index: {}]   ;;  %s2602_s2 = inlined_call_operand.hbm [shape: f32[32,256], index: 2, kind: input, shape index: {}]   ;;  %s2603_s3 = inlined_call_operand.hbm [shape: f32[64,256], index: 3, kind: input, shape index: {}]   ;;  %s2604_s4 = inlined_call_operand.vmem [shape: f32[1,256], index: 4, kind: input, shape index: {}]   ;;  %s2605_s5 = inlined_call_operand.hbm [shape: f32[64,128], index: 5, kind: input, shape index: {}]   ;;  %s2606_s6 = inlined_call_operand.vmem [shape: f32[1,128], index: 6, kind: input, shape index: {}]   ;;  %s2607_s7 = inlined_call_operand.hbm [shape: f32[64,128], index: 7, kind: output, shape index: {}]  }
   0x1   :  { %13 = vsyncpa [#allocation10], 0 }
   0x2   :  { %14 = vsyncpa [#allocation8], 0  ;;  %s2093_s24 = smov [#allocation9]   ;;  %s2094_s26 = smov [#allocation6]  }
   0x3   :  { %s36_s25 = sshll.u32 %s2093_s24, 4  ;;  %s24_s27 = sshll.u32 %s2094_s26, 4  ;;  %s37_s25 = int_to_ptr.vmem [resolvable:$true] %s36_s25  ;;  %s2143_s27 = int_to_ptr.vmem [resolvable:$true] %s24_s27 }
   0x4   :  { %s1999_s30 = scalar_lea.hbm %s2603_s3, 2048 }
   0x5   :  { %p2000_p0 = scmp.ne.s32.totalorder %s2603_s3, %s1999_s30  ;;  %p2003_p1 = scmp.lt.u32.totalorder %s1999_s30, %s2603_s3 }
   0x7   :  { %p2005_p2 = pnand %p2003_p1, %p2000_p0 }
   0x9   :  { %2008 = shalt.err (!%p2005_p2)
}
   0xa   :  { %s2009_s12 = scalar_lea.vmem %s37_s25, 2048  ;;  %p2014_p4 = scmp.lt.s32.totalorder %s37_s25, %s37_s25 }
   0xb   :  { %p2010_p3 = scmp.ne.s32.totalorder %s37_s25, %s2009_s12  ;;  %p2015_p5 = scmp.lt.s32.totalorder %s2009_s12, %s2009_s12 }
   0xd   :  { %p2016_p6 = por %p2015_p5, %p2014_p4 }
   0xf   :  { %p2017_p7 = pnand %p2016_p6, %p2010_p3 }
  0x11   :  { %2020 = shalt.err (!%p2017_p7)
}
  0x12   :  { %s2095_s13 = smov 256   ;;  %s2096_s14 = smov 16  }
  0x13   :  { %42 = dma.hbm_to_vmem [thread:$0]  %s2603_s3, 2048, %s37_s25, [#allocation10], %s2095_s13, %s2095_s13, %s2096_s14  }
  0x14   :  { %s2021_s19 = scalar_lea.hbm %s2602_s2, 1024 }
  0x15   :  { %p2022_p8 = scmp.ne.s32.totalorder %s2602_s2, %s2021_s19  ;;  %p2025_p9 = scmp.lt.u32.totalorder %s2021_s19, %s2602_s2 }
  0x17   :  { %p2027_p10 = pnand %p2025_p9, %p2022_p8 }
  0x19   :  { %2030 = shalt.err (!%p2027_p10)
}
  0x1a   :  { %s2031_s24 = scalar_lea.vmem %s2143_s27, 1024  ;;  %p2036_p12 = scmp.lt.s32.totalorder %s2143_s27, %s2143_s27 }
  0x1b   :  { %p2032_p11 = scmp.ne.s32.totalorder %s2143_s27, %s2031_s24  ;;  %p2037_p13 = scmp.lt.s32.totalorder %s2031_s24, %s2031_s24 }
  0x1d   :  { %p2038_p0 = por %p2037_p13, %p2036_p12 }
  0x1f   :  { %p2039_p1 = pnand %p2038_p0, %p2032_p11 }
  0x21   :  { %2042 = shalt.err (!%p2039_p1)
}
  0x22   :  { %30 = dma.hbm_to_vmem [thread:$0]  %s2602_s2, 1024, %s2143_s27, [#allocation7], %s2095_s13, %s2095_s13, %s2096_s14  }
  0x23   :  { %s2097_s26 = smov [#allocation11]   ;;  %s2043_s8 = scalar_lea.hbm %s2605_s5, 1024 }
  0x24   :  { %s50_s28 = sshll.u32 %s2097_s26, 4  ;;  %p2044_p2 = scmp.ne.s32.totalorder %s2605_s5, %s2043_s8  ;;  %s51_s28 = int_to_ptr.vmem [resolvable:$true] %s50_s28 }
  0x25   :  { %p2047_p3 = scmp.lt.u32.totalorder %s2043_s8, %s2605_s5 }
  0x27   :  { %p2049_p4 = pnand %p2047_p3, %p2044_p2 }
  0x29   :  { %2052 = shalt.err (!%p2049_p4)
}
  0x2a   :  { %s2053_s15 = scalar_lea.vmem %s51_s28, 1024  ;;  %p2058_p6 = scmp.lt.s32.totalorder %s51_s28, %s51_s28 }
  0x2b   :  { %p2054_p5 = scmp.ne.s32.totalorder %s51_s28, %s2053_s15  ;;  %p2059_p7 = scmp.lt.s32.totalorder %s2053_s15, %s2053_s15 }
  0x2d   :  { %p2060_p8 = por %p2059_p7, %p2058_p6 }
  0x2f   :  { %p2061_p9 = pnand %p2060_p8, %p2054_p5 }
  0x31   :  { %2064 = shalt.err (!%p2061_p9)
}
  0x32   :  { %s2098_s2 = smov 128   ;;  %s2099_s27 = smov 8  }
  0x33   :  { %56 = dma.hbm_to_vmem [thread:$0]  %s2605_s5, 1024, %s51_s28, [#allocation10], %s2098_s2, %s2098_s2, %s2099_s27  }
  0x34   :  { %2087 = dma.done.wait [#allocation7], 1024  }
  0x35   :  { %2088 = vsyncadd [#allocation7], 4294966272 }
  0x36   :  { %2089 = dma.done.wait [#allocation10], 3072  }
  0x37   :  { %2090 = vsyncadd [#allocation10], 4294964224  ;;  %vm250_vm0 = vcmask 523264   ;;  %v2100_v0 = vmov 0.0   ;;  %v77_v1 = vld [vmem:[#allocation6 + $0x8] sm:$0xff]  ;;  %v79_v2 = vld [vmem:[#allocation6 + $0x18] sm:$0xff]  ;;  %v86_v53 = vlaneseq }
  0x38   :  { %185 = vmatprep.mubr.f32.mxu1 %v2100_v0  ;;  %251 = vst.msk [vmem:[#allocation3] sm:$0xff] %vm250_vm0, %v2100_v0  ;;  %252 = vst.msk [vmem:[#allocation4] sm:$0xff] %vm250_vm0, %v2100_v0  ;;  %639 = vmatprep.mubr.f32.mxu0 %v2100_v0  ;;  %v76_v3 = vld [vmem:[#allocation6] sm:$0xff]  ;;  %v1709_v4 = vpack.c.bf16 %v79_v2, %v77_v1  ;;  %v78_v5 = vld [vmem:[#allocation6 + $0x10] sm:$0xff]  ;;  %vm96_vm1 = vcmask 261120   ;;  %s2101_s17 = smov 64  }
  0x39   :  { %v81_v6 = vld [vmem:[#allocation6 + $0x28] sm:$0xff]  ;;  %v83_v7 = vld [vmem:[#allocation6 + $0x38] sm:$0xff]  ;;  %v1711_v8 = vpack.c.bf16 %v78_v5, %v76_v3  ;;  %v80_v10 = vld [vmem:[#allocation6 + $0x20] sm:$0xff]  ;;  %v87_v56 = vshrl.u32 %v86_v53, 7  ;;  %vm401_vm2 = vcmask 523520   ;;  %s2102_s3 = smov [#allocation12]  }
  0x3a   :  { %v1713_v9 = vpack.c.bf16 %v83_v7, %v81_v6  ;;  %v82_v11 = vld [vmem:[#allocation6 + $0x30] sm:$0xff]  ;;  %1710 = vmatprep.subr.bf16.mxu1 %v1709_v4  ;;  %v258_v12 = vld [vmem:[#allocation9 + $0x8] sm:$0xff]  ;;  %v260_v13 = vld [vmem:[#allocation9 + $0x18] sm:$0xff]  ;;  %s1611_s25 = sshll.u32 %s2102_s3, 4  ;;  %s1612_s25 = int_to_ptr.vmem [resolvable:$true] %s1611_s25 }
  0x3b   :  { %v257_v14 = vld [vmem:[#allocation9] sm:$0xff]  ;;  %1712 = vmatpush1.bf16.msra.mxu1 %v1711_v8  ;;  %v1715_v15 = vpack.c.bf16 %v82_v11, %v80_v10  ;;  %v2195_v16 = vpack.c.bf16 %v260_v13, %v258_v12  ;;  %v259_v17 = vld [vmem:[#allocation9 + $0x10] sm:$0xff]  ;;  %v262_v19 = vld [vmem:[#allocation9 + $0x28] sm:$0xff]  ;;  %v88_v59 = vsub.s32 0, %v87_v56  ;;  %v92_v5 = vsub.s32 1, %v87_v56  ;;  %p2070_p11 = scmp.lt.s32.totalorder %s1612_s25, %s1612_s25 }
  0x3c   :  { %1714 = vmatprep.subr.bf16.mxu1 %v1713_v9  ;;  %v2197_v18 = vpack.c.bf16 %v259_v17, %v257_v14  ;;  %v264_v20 = vld [vmem:[#allocation9 + $0x38] sm:$0xff]  ;;  %v68_v22 = vld [vmem:[%s2600_s0] sm:$0xff]  ;;  %v261_v23 = vld [vmem:[#allocation9 + $0x20] sm:$0xff] }
  0x3d   :  { %v2199_v21 = vpack.c.bf16 %v264_v20, %v262_v19  ;;  %1750 = vmatprep.subr.bf16.mxu0 %v2195_v16  ;;  %v263_v24 = vld [vmem:[#allocation9 + $0x30] sm:$0xff]  ;;  %v266_v25 = vld [vmem:[#allocation9 + $0x48] sm:$0xff]  ;;  %v268_v26 = vld [vmem:[#allocation9 + $0x58] sm:$0xff] }
  0x3e   :  { %1752 = vmatpush1.bf16.msra.mxu0 %v2197_v18  ;;  %v69_v29 = vld [vmem:[%s2600_s0 + $0x8] sm:$0xff]  ;;  %v2220_v30 = vpack.c.bf16 %v263_v24, %v261_v23  ;;  %v2223_v31 = vpack.c.bf16 %v268_v26, %v266_v25  ;;  %v265_v32 = vld [vmem:[#allocation9 + $0x40] sm:$0xff]  ;;  %v267_v33 = vld [vmem:[#allocation9 + $0x50] sm:$0xff] }
  0x3f   :  { %1716 = vmatpush1.bf16.msra.mxu1 %v1715_v15  ;;  %1754 = vmatprep.subr.bf16.mxu0 %v2199_v21  ;;  %v2208_v27 = vld [vmem:[#allocation3] sm:$0xff]  ;;  %v2211_v28 = vld [vmem:[#allocation4] sm:$0xff]  ;;  %v270_v34 = vld [vmem:[#allocation9 + $0x68] sm:$0xff]  ;;  %v2235_v37 = vpack.c.bf16 %v267_v33, %v265_v32 }
  0x40   :  { %1718 = vmatprep.subr.bf16.mxu1 %v2195_v16  ;;  %376 = vrot.lane.b32.xlu1 %v2208_v27, %s2101_s17  ;;  %v272_v35 = vld [vmem:[#allocation9 + $0x78] sm:$0xff]  ;;  %v70_v36 = vld [vmem:[%s2600_s0 + $0x10] sm:$0xff]  ;;  %v271_v40 = vld [vmem:[#allocation9 + $0x70] sm:$0xff] }
  0x41   :  { %363 = vrot.lane.b32.xlu0 %v2211_v28, %s2101_s17  ;;  %v2238_v38 = vpack.c.bf16 %v272_v35, %v270_v34  ;;  %v269_v39 = vld [vmem:[#allocation9 + $0x60] sm:$0xff]  ;;  %v71_v41 = vld [vmem:[%s2600_s0 + $0x18] sm:$0xff]  ;;  %v72_v43 = vld [vmem:[%s2600_s0 + $0x20] sm:$0xff] }
  0x42   :  { %1624 = vmatmul.mubr.msk.f32.vlgmr.msra.gmra.mrb[0].mxu1 %vm96_vm1, %v68_v22  ;;  %1756 = vmatpush1.bf16.msra.mxu0 %v2220_v30  ;;  %v2248_v42 = vpack.c.bf16 %v271_v40, %v269_v39  ;;  %v73_v44 = vld [vmem:[%s2600_s0 + $0x28] sm:$0xff]  ;;  %v74_v45 = vld [vmem:[%s2600_s0 + $0x30] sm:$0xff]  ;;  %v75_v46 = vld [vmem:[%s2600_s0 + $0x38] sm:$0xff] }
  0x43   :  { %1720 = vmatpush1.bf16.msra.mxu1 %v2197_v18  ;;  %191 = vmatprep.mubr.f32.mxu1 %v2100_v0  ;;  %v84_v60 = vld [vmem:[%s2604_s4] sm:$0x3] }
  0x44   :  { %1722 = vmatprep.subr.bf16.mxu1 %v2199_v21  ;;  %1758 = vmatprep.subr.bf16.mxu0 %v2223_v31  ;;  %v2314_v63 = vrot.slane %v84_v60, %v88_v59  ;;  %v2317_v6 = vrot.slane %v84_v60, %v92_v5  ;;  %v2329_v33 = vld [vmem:[%s2601_s1] sm:$0xff] }
  0x46   :  { %1625 = vmatmul.mubr.msk.f32.gmra.mrb[2].mxu1 %vm96_vm1, %v69_v29  ;;  %1760 = vmatpush1.bf16.msra.mxu0 %v2235_v37 }
  0x47   :  { %197 = vmatprep.mubr.f32.mxu1 %v2100_v0  ;;  %1724 = vmatpush1.bf16.msra.mxu1 %v2220_v30 }
  0x48   :  { %1726 = vmatprep.subr.bf16.mxu1 %v2223_v31  ;;  %1762 = vmatprep.subr.bf16.mxu0 %v2238_v38 }
  0x4a   :  { %1626 = vmatmul.mubr.msk.f32.gmra.mrb[4].mxu1 %vm96_vm1, %v70_v36  ;;  %1764 = vmatpush1.bf16.msra.mxu0 %v2248_v42 }
  0x4b   :  { %203 = vmatprep.mubr.f32.mxu1 %v2100_v0  ;;  %1728 = vmatpush1.bf16.msra.mxu1 %v2235_v37 }
  0x4c   :  { %1730 = vmatprep.subr.bf16.mxu1 %v2238_v38  ;;  %1766 = vmatprep.subr.bf16.mxu0 %v2195_v16 }
  0x4e   :  { %1627 = vmatmul.mubr.msk.f32.gmra.mrb[6].mxu1 %vm96_vm1, %v71_v41 }
  0x4f   :  { %209 = vmatprep.mubr.f32.mxu1 %v2100_v0  ;;  %1732 = vmatpush1.bf16.msra.mxu1 %v2248_v42 }
  0x50   :  { %1734 = vmatprep.subr.bf16.mxu1 %v2195_v16 }
  0x52   :  { %1628 = vmatmul.mubr.msk.f32.gmra.mrb[8].mxu1 %vm96_vm1, %v72_v43 }
  0x53   :  { %215 = vmatprep.mubr.f32.mxu1 %v2100_v0 }
  0x56   :  { %1629 = vmatmul.mubr.msk.f32.gmra.mrb[10].mxu1 %vm96_vm1, %v73_v44 }
  0x57   :  { %221 = vmatprep.mubr.f32.mxu1 %v2100_v0 }
  0x5a   :  { %1630 = vmatmul.mubr.msk.f32.gmra.mrb[12].mxu1 %vm96_vm1, %v74_v45 }
  0x5b   :  { %227 = vmatprep.mubr.f32.mxu1 %v2100_v0 }
  0x5e   :  { %1631 = vmatmul.mubr.msk.f32.gmra.mrb[14].mxu1 %vm96_vm1, %v75_v46 }
  0x5f   :  { %340 = vmatprep.mubr.f32.mxu1 %v2100_v0 }
  0x62   :  { %1632 = vmatmul.mubr.msk.f32.vlgmr.msra.gmra.mrb[0].mxu1 %vm250_vm0, %v2208_v27 }
  0x63   :  { %1736 = vmatpush1.bf16.msra.mxu1 %v2197_v18  ;;  %490 = vmatprep.mubr.f32.mxu1 %v2100_v0 }
  0x64   :  { %1738 = vmatprep.subr.bf16.mxu1 %v2199_v21 }
  0x67   :  { %1740 = vmatpush1.bf16.msra.mxu1 %v2220_v30 }
  0x68   :  { %1742 = vmatprep.subr.bf16.mxu1 %v2223_v31 }
  0x6b   :  { %1744 = vmatpush1.bf16.msra.mxu1 %v2235_v37 }
  0x6c   :  { %1746 = vmatprep.subr.bf16.mxu1 %v2238_v38 }
  0x6f   :  { %1748 = vmatpush1.bf16.msra.mxu1 %v2248_v42 }
  0xb2   :  { %v377_v26 = vpop.permute.xlu1 %376 }
  0xb3   :  { %v364_v15 = vpop.permute.xlu0 %363 }
 0x11d   :  { %v2287_v47 = vpop.f32.mrb[4].mxu1 }
 0x11e   :  { %v2289_v48 = vpop.f32.mrb[5].mxu1 }
 0x121   :  { %v2291_v49 = vpop.f32.mrb[6].mxu1 }
 0x122   :  { %v2293_v50 = vpop.f32.mrb[7].mxu1 }
 0x125   :  { %v2295_v51 = vpop.f32.mrb[8].mxu1 }
 0x126   :  { %v2297_v52 = vpop.f32.mrb[9].mxu1 }
 0x129   :  { %v2299_v54 = vpop.f32.mrb[10].mxu1 }
 0x12a   :  { %v2301_v55 = vpop.f32.mrb[11].mxu1 }
 0x12d   :  { %v2303_v57 = vpop.f32.mrb[12].mxu1 }
 0x12e   :  { %v2305_v58 = vpop.f32.mrb[13].mxu1 }
 0x131   :  { %v2310_v61 = vpop.f32.mrb[14].mxu1 }
 0x132   :  { %v2312_v62 = vpop.f32.mrb[15].mxu1 }
 0x135   :  { %v342_v1 = vpop.f32.mrb[0].mxu1 }
 0x136   :  { %v1861_v2 = vadd.f32 %v342_v1, %v2314_v63  ;;  %v344_v3 = vpop.f32.mrb[1].mxu1 }
 0x137   :  { %v1862_v7 = vadd.f32 %v344_v3, %v2317_v6 }
 0x138   :  { %v1633_v4 = vmul.f32 -1.442695, %v1861_v2 }
 0x139   :  { %v1634_v13 = vmul.f32 -1.442695, %v1862_v7 }
 0x13a   :  { %1903 = vpow2.f32 %v1633_v4 }
 0x13b   :  { %1905 = vtanh.f32 %v1862_v7 }
 0x144   :  { %v1904_v8 = vpop.eup %1903 }
 0x145   :  { %v355_v9 = vadd.f32 1.0, %v1904_v8  ;;  %v1906_v10 = vpop.eup %1905 }
 0x147   :  { %1907 = vrcp.f32 %v355_v9 }
 0x148   :  { %1909 = vpow2.f32 %v1634_v13 }
 0x151   :  { %v1908_v11 = vpop.eup %1907 }
 0x152   :  { %v367_v12 = vmul.f32 %v1908_v11, %v1906_v10  ;;  %v1910_v14 = vpop.eup %1909  ;;  %v366_v19 = vmul.f32 %v1908_v11, %v364_v15 }
 0x153   :  { %v356_v17 = vadd.f32 1.0, %v1910_v14 }
 0x154   :  { %369 = vrot.lane.b32.xlu0 %v367_v12, %s2101_s17 }
 0x155   :  { %1911 = vrcp.f32 %v356_v17 }
 0x15f   :  { %v1912_v24 = vpop.eup %1911 }
 0x1c6   :  { %v370_v20 = vpop.permute.xlu0 %369 }
 0x1c7   :  { %v372_v22 = vadd.f32 %v370_v20, %v366_v19  ;;  %v2351_v19 = vld [vmem:[%s2601_s1 + $0x8] sm:$0xff] }
 0x1c9   :  { %1913 = vtanh.f32 %v372_v22  ;;  %v387_v23 = vsub.f32 %v372_v22, %v364_v15 }
 0x1cb   :  { %389 = vrot.lane.b32.xlu0 %v387_v23, %s2101_s17 }
 0x1d3   :  { %v1914_v25 = vpop.eup %1913 }
 0x1d4   :  { %v2322_v29 = vmul.f32 %v1914_v25, %v1912_v24 }
 0x1d6   :  { %v379_v32 = vsub.f32 %v2322_v29, %v377_v26 }
 0x1d8   :  { %381 = vrot.lane.b32.xlu1 %v379_v32, %s2101_s17 }
 0x23d   :  { %v390_v34 = vpop.permute.xlu0 %389 }
 0x23e   :  { %v392_v35 = vmul.f32 %v390_v34, %v2329_v33 }
 0x240   :  { %v393_v36 = vadd.f32 %v392_v35, %v2211_v28  ;;  %v200_v35 = vadd.f32 %v2287_v47, %v2314_v63 }
 0x242   :  { %394 = vst.msk [vmem:[#allocation4] sm:$0xff] %vm250_vm0, %v393_v36  ;;  %v202_v36 = vadd.f32 %v2289_v48, %v2317_v6 }
 0x249   :  { %v404_v39 = vld [vmem:[#allocation4] sm:$0xff] }
 0x24a   :  { %513 = vrot.lane.b32.xlu1 %v404_v39, %s2101_s17  ;;  %v382_v40 = vpop.permute.xlu1 %381 }
 0x24b   :  { %v384_v41 = vmul.f32 %v382_v40, %v2329_v33 }
 0x24d   :  { %v385_v43 = vadd.f32 %v384_v41, %v2208_v27 }
 0x24f   :  { %386 = vst.msk [vmem:[#allocation3] sm:$0xff] %vm250_vm0, %v385_v43 }
 0x256   :  { %v403_v44 = vld [vmem:[#allocation3] sm:$0xff] }
 0x257   :  { %526 = vrot.lane.b32.xlu1 %v403_v44, %s2101_s17  ;;  %1635 = vmatmul.mubr.msk.f32.vlgmr.msra.gmra.mrb[2].mxu1 %vm250_vm0, %v403_v44 }
 0x2bc   :  { %v514_v5 = vpop.permute.xlu1 %513 }
 0x2c9   :  { %v527_v15 = vpop.permute.xlu1 %526 }
 0x32a   :  { %v492_v45 = vpop.f32.mrb[2].mxu1 }
 0x32b   :  { %v1863_v28 = vadd.f32 %v492_v45, %v2314_v63  ;;  %v494_v46 = vpop.f32.mrb[3].mxu1 }
 0x32c   :  { %v1864_v56 = vadd.f32 %v494_v46, %v2317_v6 }
 0x32d   :  { %v1636_v53 = vmul.f32 -1.442695, %v1863_v28 }
 0x32e   :  { %v1637_v3 = vmul.f32 -1.442695, %v1864_v56 }
 0x32f   :  { %1915 = vpow2.f32 %v1636_v53 }
 0x330   :  { %1917 = vtanh.f32 %v1864_v56 }
 0x339   :  { %v1916_v59 = vpop.eup %1915 }
 0x33a   :  { %v505_v60 = vadd.f32 1.0, %v1916_v59  ;;  %v1918_v27 = vpop.eup %1917 }
 0x33c   :  { %1919 = vrcp.f32 %v505_v60 }
 0x33d   :  { %1921 = vpow2.f32 %v1637_v3 }
 0x346   :  { %v1920_v1 = vpop.eup %1919 }
 0x347   :  { %v517_v2 = vmul.f32 %v1920_v1, %v1918_v27  ;;  %v1922_v4 = vpop.eup %1921  ;;  %v516_v8 = vmul.f32 %v1920_v1, %v514_v5 }
 0x348   :  { %v506_v7 = vadd.f32 1.0, %v1922_v4 }
 0x349   :  { %519 = vrot.lane.b32.xlu0 %v517_v2, %s2101_s17 }
 0x34a   :  { %1923 = vrcp.f32 %v506_v7 }
 0x354   :  { %v1924_v12 = vpop.eup %1923 }
 0x3bb   :  { %v520_v9 = vpop.permute.xlu0 %519 }
 0x3bc   :  { %v522_v10 = vadd.f32 %v520_v9, %v516_v8 }
 0x3be   :  { %1925 = vtanh.f32 %v522_v10  ;;  %v537_v11 = vsub.f32 %v522_v10, %v514_v5  ;;  %v2382_v10 = vld [vmem:[%s2601_s1 + $0x10] sm:$0xff] }
 0x3c0   :  { %539 = vrot.lane.b32.xlu1 %v537_v11, %s2101_s17 }
 0x3c8   :  { %v1926_v13 = vpop.eup %1925 }
 0x3c9   :  { %v2344_v14 = vmul.f32 %v1926_v13, %v1924_v12 }
 0x3cb   :  { %v529_v17 = vsub.f32 %v2344_v14, %v527_v15 }
 0x3cd   :  { %531 = vrot.lane.b32.xlu0 %v529_v17, %s2101_s17 }
 0x432   :  { %v540_v20 = vpop.permute.xlu1 %539 }
 0x433   :  { %v542_v22 = vmul.f32 %v540_v20, %v2351_v19 }
 0x435   :  { %v543_v23 = vadd.f32 %v542_v22, %v404_v39 }
 0x437   :  { %544 = vst.msk [vmem:[#allocation4] sm:$0xff] %vm250_vm0, %v543_v23 }
 0x43e   :  { %v553_v24 = vld [vmem:[#allocation4] sm:$0xff] }
 0x43f   :  { %v532_v25 = vpop.permute.xlu0 %531  ;;  %662 = vrot.lane.b32.xlu0 %v553_v24, %s2101_s17 }
 0x440   :  { %v534_v26 = vmul.f32 %v532_v25, %v2351_v19  ;;  %v208_v25 = vadd.f32 %v2293_v50, %v2317_v6 }
 0x442   :  { %v535_v32 = vadd.f32 %v534_v26, %v403_v44 }
 0x444   :  { %536 = vst.msk [vmem:[#allocation3] sm:$0xff] %vm250_vm0, %v535_v32 }
 0x44b   :  { %v552_v34 = vld [vmem:[#allocation3] sm:$0xff] }
 0x44c   :  { %1638 = vmatmul.mubr.msk.f32.vlgmr.msra.gmra.mrb[0].mxu0 %vm250_vm0, %v552_v34  ;;  %675 = vrot.lane.b32.xlu0 %v552_v34, %s2101_s17 }
 0x44d   :  { %1768 = vmatpush1.bf16.msra.mxu0 %v2197_v18  ;;  %788 = vmatprep.mubr.f32.mxu0 %v2100_v0 }
 0x44e   :  { %1770 = vmatprep.subr.bf16.mxu0 %v2199_v21 }
 0x451   :  { %1772 = vmatpush1.bf16.msra.mxu0 %v2220_v30 }
 0x452   :  { %1774 = vmatprep.subr.bf16.mxu0 %v2223_v31 }
 0x455   :  { %1776 = vmatpush1.bf16.msra.mxu0 %v2235_v37 }
 0x456   :  { %1778 = vmatprep.subr.bf16.mxu0 %v2238_v38 }
 0x459   :  { %1780 = vmatpush1.bf16.msra.mxu0 %v2248_v42 }
 0x45a   :  { %1782 = vmatprep.subr.bf16.mxu0 %v2195_v16 }
 0x4b1   :  { %v663_v60 = vpop.permute.xlu0 %662 }
 0x4be   :  { %v676_v8 = vpop.permute.xlu0 %675 }
 0x51f   :  { %v641_v39 = vpop.f32.mrb[0].mxu0 }
 0x520   :  { %v646_v40 = vadd.f32 %v641_v39, %v200_v35  ;;  %v643_v41 = vpop.f32.mrb[1].mxu0 }
 0x521   :  { %v647_v43 = vadd.f32 %v643_v41, %v202_v36 }
 0x522   :  { %v1639_v44 = vmul.f32 -1.442695, %v646_v40 }
 0x523   :  { %v1640_v59 = vmul.f32 -1.442695, %v647_v43 }
 0x524   :  { %1927 = vpow2.f32 %v1639_v44 }
 0x525   :  { %1929 = vtanh.f32 %v647_v43 }
 0x52e   :  { %v1928_v45 = vpop.eup %1927 }
 0x52f   :  { %v654_v28 = vadd.f32 1.0, %v1928_v45  ;;  %v1930_v46 = vpop.eup %1929 }
 0x531   :  { %1931 = vrcp.f32 %v654_v28 }
 0x532   :  { %1933 = vpow2.f32 %v1640_v59 }
 0x53b   :  { %v1932_v53 = vpop.eup %1931 }
 0x53c   :  { %v666_v56 = vmul.f32 %v1932_v53, %v1930_v46  ;;  %v1934_v47 = vpop.eup %1933  ;;  %v665_v27 = vmul.f32 %v1932_v53, %v663_v60 }
 0x53d   :  { %v655_v48 = vadd.f32 1.0, %v1934_v47 }
 0x53e   :  { %668 = vrot.lane.b32.xlu1 %v666_v56, %s2101_s17 }
 0x53f   :  { %1935 = vrcp.f32 %v655_v48 }
 0x549   :  { %v1936_v4 = vpop.eup %1935 }
 0x5b0   :  { %v669_v1 = vpop.permute.xlu1 %668 }
 0x5b1   :  { %v671_v2 = vadd.f32 %v669_v1, %v665_v27 }
 0x5b3   :  { %1937 = vtanh.f32 %v671_v2  ;;  %v686_v3 = vsub.f32 %v671_v2, %v663_v60  ;;  %v2413_v2 = vld [vmem:[%s2601_s1 + $0x18] sm:$0xff] }
 0x5b5   :  { %688 = vrot.lane.b32.xlu0 %v686_v3, %s2101_s17 }
 0x5bd   :  { %v1938_v5 = vpop.eup %1937 }
 0x5be   :  { %v2375_v7 = vmul.f32 %v1938_v5, %v1936_v4 }
 0x5c0   :  { %v678_v9 = vsub.f32 %v2375_v7, %v676_v8 }
 0x5c2   :  { %680 = vrot.lane.b32.xlu1 %v678_v9, %s2101_s17 }
 0x627   :  { %v689_v11 = vpop.permute.xlu0 %688 }
 0x628   :  { %v691_v12 = vmul.f32 %v689_v11, %v2382_v10 }
 0x62a   :  { %v692_v13 = vadd.f32 %v691_v12, %v553_v24  ;;  %v206_v24 = vadd.f32 %v2291_v49, %v2314_v63 }
 0x62c   :  { %693 = vst.msk [vmem:[#allocation4] sm:$0xff] %vm250_vm0, %v692_v13 }
 0x633   :  { %v702_v15 = vld [vmem:[#allocation4] sm:$0xff] }
 0x634   :  { %811 = vrot.lane.b32.xlu1 %v702_v15, %s2101_s17  ;;  %v681_v17 = vpop.permute.xlu1 %680 }
 0x635   :  { %v683_v20 = vmul.f32 %v681_v17, %v2382_v10  ;;  %v214_v17 = vadd.f32 %v2297_v52, %v2317_v6 }
 0x637   :  { %v684_v22 = vadd.f32 %v683_v20, %v552_v34 }
 0x639   :  { %685 = vst.msk [vmem:[#allocation3] sm:$0xff] %vm250_vm0, %v684_v22 }
 0x640   :  { %v701_v23 = vld [vmem:[#allocation3] sm:$0xff] }
 0x641   :  { %824 = vrot.lane.b32.xlu1 %v701_v23, %s2101_s17  ;;  %1641 = vmatmul.mubr.msk.f32.vlgmr.msra.gmra.mrb[2].mxu0 %vm250_vm0, %v701_v23 }
 0x642   :  { %1784 = vmatpush1.bf16.msra.mxu0 %v2197_v18  ;;  %937 = vmatprep.mubr.f32.mxu0 %v2100_v0 }
 0x643   :  { %1786 = vmatprep.subr.bf16.mxu0 %v2199_v21 }
 0x646   :  { %1788 = vmatpush1.bf16.msra.mxu0 %v2220_v30 }
 0x647   :  { %1790 = vmatprep.subr.bf16.mxu0 %v2223_v31 }
 0x64a   :  { %1792 = vmatpush1.bf16.msra.mxu0 %v2235_v37 }
 0x64b   :  { %1794 = vmatprep.subr.bf16.mxu0 %v2238_v38 }
 0x64e   :  { %1796 = vmatpush1.bf16.msra.mxu0 %v2248_v42 }
 0x64f   :  { %1798 = vmatprep.subr.bf16.mxu0 %v2195_v16 }
 0x6a6   :  { %v812_v28 = vpop.permute.xlu1 %811 }
 0x6b3   :  { %v825_v27 = vpop.permute.xlu1 %824 }
 0x714   :  { %v790_v26 = vpop.f32.mrb[2].mxu0 }
 0x715   :  { %v795_v32 = vadd.f32 %v790_v26, %v206_v24  ;;  %v792_v34 = vpop.f32.mrb[3].mxu0 }
 0x716   :  { %v796_v35 = vadd.f32 %v792_v34, %v208_v25 }
 0x717   :  { %v1642_v36 = vmul.f32 -1.442695, %v795_v32 }
 0x718   :  { %v1643_v45 = vmul.f32 -1.442695, %v796_v35 }
 0x719   :  { %1939 = vpow2.f32 %v1642_v36 }
 0x71a   :  { %1941 = vtanh.f32 %v796_v35 }
 0x723   :  { %v1940_v39 = vpop.eup %1939 }
 0x724   :  { %v803_v40 = vadd.f32 1.0, %v1940_v39  ;;  %v1942_v41 = vpop.eup %1941 }
 0x726   :  { %1943 = vrcp.f32 %v803_v40 }
 0x727   :  { %1945 = vpow2.f32 %v1643_v45 }
 0x730   :  { %v1944_v43 = vpop.eup %1943 }
 0x731   :  { %v815_v44 = vmul.f32 %v1944_v43, %v1942_v41  ;;  %v1946_v49 = vpop.eup %1945  ;;  %v814_v46 = vmul.f32 %v1944_v43, %v812_v28 }
 0x732   :  { %v804_v50 = vadd.f32 1.0, %v1946_v49 }
 0x733   :  { %817 = vrot.lane.b32.xlu0 %v815_v44, %s2101_s17 }
 0x734   :  { %1947 = vrcp.f32 %v804_v50 }
 0x73e   :  { %v1948_v47 = vpop.eup %1947 }
 0x7a5   :  { %v818_v53 = vpop.permute.xlu0 %817 }
 0x7a6   :  { %v820_v56 = vadd.f32 %v818_v53, %v814_v46  ;;  %v2444_v53 = vld [vmem:[%s2601_s1 + $0x20] sm:$0xff] }
 0x7a8   :  { %1949 = vtanh.f32 %v820_v56  ;;  %v835_v59 = vsub.f32 %v820_v56, %v812_v28 }
 0x7aa   :  { %837 = vrot.lane.b32.xlu1 %v835_v59, %s2101_s17 }
 0x7b2   :  { %v1950_v60 = vpop.eup %1949 }
 0x7b3   :  { %v2406_v48 = vmul.f32 %v1950_v60, %v1948_v47 }
 0x7b5   :  { %v827_v1 = vsub.f32 %v2406_v48, %v825_v27 }
 0x7b7   :  { %829 = vrot.lane.b32.xlu0 %v827_v1, %s2101_s17 }
 0x81c   :  { %v838_v3 = vpop.permute.xlu1 %837 }
 0x81d   :  { %v840_v4 = vmul.f32 %v838_v3, %v2413_v2 }
 0x81f   :  { %v841_v5 = vadd.f32 %v840_v4, %v702_v15  ;;  %v212_v15 = vadd.f32 %v2295_v51, %v2314_v63 }
 0x821   :  { %842 = vst.msk [vmem:[#allocation4] sm:$0xff] %vm250_vm0, %v841_v5  ;;  %v218_v5 = vadd.f32 %v2299_v54, %v2314_v63 }
 0x828   :  { %v851_v8 = vld [vmem:[#allocation4] sm:$0xff] }
 0x829   :  { %v830_v9 = vpop.permute.xlu0 %829  ;;  %960 = vrot.lane.b32.xlu0 %v851_v8, %s2101_s17 }
 0x82a   :  { %v832_v11 = vmul.f32 %v830_v9, %v2413_v2 }
 0x82c   :  { %v833_v12 = vadd.f32 %v832_v11, %v701_v23 }
 0x82e   :  { %834 = vst.msk [vmem:[#allocation3] sm:$0xff] %vm250_vm0, %v833_v12 }
 0x835   :  { %v850_v13 = vld [vmem:[#allocation3] sm:$0xff] }
 0x836   :  { %1644 = vmatmul.mubr.msk.f32.vlgmr.msra.gmra.mrb[4].mxu0 %vm250_vm0, %v850_v13  ;;  %973 = vrot.lane.b32.xlu0 %v850_v13, %s2101_s17 }
 0x837   :  { %1800 = vmatpush1.bf16.msra.mxu0 %v2197_v18  ;;  %1086 = vmatprep.mubr.f32.mxu0 %v2100_v0 }
 0x838   :  { %1802 = vmatprep.subr.bf16.mxu0 %v2199_v21 }
 0x83b   :  { %1804 = vmatpush1.bf16.msra.mxu0 %v2220_v30 }
 0x83c   :  { %1806 = vmatprep.subr.bf16.mxu0 %v2223_v31 }
 0x83f   :  { %1808 = vmatpush1.bf16.msra.mxu0 %v2235_v37 }
 0x840   :  { %1810 = vmatprep.subr.bf16.mxu0 %v2238_v38 }
 0x843   :  { %1812 = vmatpush1.bf16.msra.mxu0 %v2248_v42 }
 0x844   :  { %1814 = vmatprep.subr.bf16.mxu0 %v2195_v16 }
 0x89b   :  { %v961_v39 = vpop.permute.xlu0 %960 }
 0x8a8   :  { %v974_v50 = vpop.permute.xlu0 %973 }
 0x909   :  { %v939_v20 = vpop.f32.mrb[4].mxu0 }
 0x90a   :  { %v944_v22 = vadd.f32 %v939_v20, %v212_v15  ;;  %v941_v23 = vpop.f32.mrb[5].mxu0 }
 0x90b   :  { %v945_v24 = vadd.f32 %v941_v23, %v214_v17 }
 0x90c   :  { %v1645_v25 = vmul.f32 -1.442695, %v944_v22 }
 0x90d   :  { %v1646_v16 = vmul.f32 -1.442695, %v945_v24 }
 0x90e   :  { %1951 = vpow2.f32 %v1645_v25 }
 0x90f   :  { %1953 = vtanh.f32 %v945_v24 }
 0x918   :  { %v1952_v26 = vpop.eup %1951 }
 0x919   :  { %v952_v32 = vadd.f32 1.0, %v1952_v26  ;;  %v1954_v34 = vpop.eup %1953 }
 0x91b   :  { %1955 = vrcp.f32 %v952_v32 }
 0x91c   :  { %1957 = vpow2.f32 %v1646_v16 }
 0x925   :  { %v1956_v35 = vpop.eup %1955 }
 0x926   :  { %v964_v36 = vmul.f32 %v1956_v35, %v1954_v34  ;;  %v1958_v51 = vpop.eup %1957  ;;  %v963_v40 = vmul.f32 %v1956_v35, %v961_v39  ;;  %v2474_v35 = vld [vmem:[%s2601_s1 + $0x28] sm:$0xff] }
 0x927   :  { %v953_v52 = vadd.f32 1.0, %v1958_v51 }
 0x928   :  { %966 = vrot.lane.b32.xlu1 %v964_v36, %s2101_s17 }
 0x929   :  { %1959 = vrcp.f32 %v953_v52 }
 0x933   :  { %v1960_v45 = vpop.eup %1959 }
 0x99a   :  { %v967_v41 = vpop.permute.xlu1 %966 }
 0x99b   :  { %v969_v43 = vadd.f32 %v967_v41, %v963_v40 }
 0x99d   :  { %1961 = vtanh.f32 %v969_v43  ;;  %v984_v44 = vsub.f32 %v969_v43, %v961_v39 }
 0x99f   :  { %986 = vrot.lane.b32.xlu0 %v984_v44, %s2101_s17  ;;  %v224_v44 = vadd.f32 %v2303_v57, %v2314_v63 }
 0x9a7   :  { %v1962_v49 = vpop.eup %1961 }
 0x9a8   :  { %v2437_v28 = vmul.f32 %v1962_v49, %v1960_v45  ;;  %v226_v45 = vadd.f32 %v2305_v58, %v2317_v6  ;;  %v1304_v58 = vld [vmem:[#allocation9 + $0x18] sm:$0xff] }
 0x9aa   :  { %v976_v46 = vsub.f32 %v2437_v28, %v974_v50 }
 0x9ac   :  { %978 = vrot.lane.b32.xlu1 %v976_v46, %s2101_s17 }
 0xa11   :  { %v987_v56 = vpop.permute.xlu0 %986 }
 0xa12   :  { %v989_v59 = vmul.f32 %v987_v56, %v2444_v53 }
 0xa14   :  { %v990_v47 = vadd.f32 %v989_v59, %v851_v8 }
 0xa16   :  { %991 = vst.msk [vmem:[#allocation4] sm:$0xff] %vm250_vm0, %v990_v47 }
 0xa1d   :  { %v1000_v60 = vld [vmem:[#allocation4] sm:$0xff] }
 0xa1e   :  { %1109 = vrot.lane.b32.xlu1 %v1000_v60, %s2101_s17  ;;  %v979_v27 = vpop.permute.xlu1 %978 }
 0xa1f   :  { %v981_v1 = vmul.f32 %v979_v27, %v2444_v53 }
 0xa21   :  { %v982_v3 = vadd.f32 %v981_v1, %v850_v13 }
 0xa23   :  { %983 = vst.msk [vmem:[#allocation3] sm:$0xff] %vm250_vm0, %v982_v3 }
 0xa2a   :  { %v999_v4 = vld [vmem:[#allocation3] sm:$0xff] }
 0xa2b   :  { %1122 = vrot.lane.b32.xlu1 %v999_v4, %s2101_s17  ;;  %1647 = vmatmul.mubr.msk.f32.vlgmr.msra.gmra.mrb[6].mxu0 %vm250_vm0, %v999_v4 }
 0xa2c   :  { %1816 = vmatpush1.bf16.msra.mxu0 %v2197_v18  ;;  %1235 = vmatprep.mubr.f32.mxu0 %v2100_v0  ;;  %v220_v18 = vadd.f32 %v2301_v55, %v2317_v6 }
 0xa2d   :  { %1818 = vmatprep.subr.bf16.mxu0 %v2199_v21 }
 0xa30   :  { %1820 = vmatpush1.bf16.msra.mxu0 %v2220_v30 }
 0xa31   :  { %1822 = vmatprep.subr.bf16.mxu0 %v2223_v31 }
 0xa34   :  { %1824 = vmatpush1.bf16.msra.mxu0 %v2235_v37 }
 0xa35   :  { %1826 = vmatprep.subr.bf16.mxu0 %v2238_v38 }
 0xa38   :  { %1828 = vmatpush1.bf16.msra.mxu0 %v2248_v42 }
 0xa90   :  { %v1110_v15 = vpop.permute.xlu1 %1109 }
 0xa9d   :  { %v1123_v32 = vpop.permute.xlu1 %1122 }
 0xafe   :  { %v1088_v8 = vpop.f32.mrb[6].mxu0 }
 0xaff   :  { %v1093_v9 = vadd.f32 %v1088_v8, %v218_v5  ;;  %v1090_v11 = vpop.f32.mrb[7].mxu0  ;;  %v1301_v5 = vld [vmem:[#allocation9] sm:$0xff]  ;;  %v1303_v8 = vld [vmem:[#allocation9 + $0x10] sm:$0xff] }
 0xb00   :  { %v1094_v21 = vadd.f32 %v1090_v11, %v220_v18 }
 0xb01   :  { %v1648_v12 = vmul.f32 -1.442695, %v1093_v9 }
 0xb02   :  { %v1649_v42 = vmul.f32 -1.442695, %v1094_v21 }
 0xb03   :  { %1963 = vpow2.f32 %v1648_v12 }
 0xb04   :  { %1965 = vtanh.f32 %v1094_v21  ;;  %v1831_v21 = vpack.c.bf16 %v1303_v8, %v1301_v5 }
 0xb0d   :  { %v1964_v30 = vpop.eup %1963 }
 0xb0e   :  { %v1101_v31 = vadd.f32 1.0, %v1964_v30  ;;  %v1966_v37 = vpop.eup %1965 }
 0xb10   :  { %1967 = vrcp.f32 %v1101_v31 }
 0xb11   :  { %1969 = vpow2.f32 %v1649_v42 }
 0xb1a   :  { %v1968_v38 = vpop.eup %1967 }
 0xb1b   :  { %v1113_v13 = vmul.f32 %v1968_v38, %v1966_v37  ;;  %v1970_v54 = vpop.eup %1969  ;;  %v1112_v17 = vmul.f32 %v1968_v38, %v1110_v15  ;;  %v1306_v37 = vld [vmem:[#allocation9 + $0x28] sm:$0xff]  ;;  %v1308_v38 = vld [vmem:[#allocation9 + $0x38] sm:$0xff] }
 0xb1c   :  { %v1102_v55 = vadd.f32 1.0, %v1970_v54  ;;  %v1833_v42 = vpack.c.bf16 %v1308_v38, %v1306_v37  ;;  %v1305_v54 = vld [vmem:[#allocation9 + $0x20] sm:$0xff] }
 0xb1d   :  { %1115 = vrot.lane.b32.xlu0 %v1113_v13, %s2101_s17 }
 0xb1e   :  { %1971 = vrcp.f32 %v1102_v55 }
 0xb28   :  { %v1972_v24 = vpop.eup %1971 }
 0xb8f   :  { %v1116_v20 = vpop.permute.xlu0 %1115 }
 0xb90   :  { %v1118_v22 = vadd.f32 %v1116_v20, %v1112_v17  ;;  %v1310_v17 = vld [vmem:[#allocation9 + $0x48] sm:$0xff]  ;;  %v1312_v20 = vld [vmem:[#allocation9 + $0x58] sm:$0xff] }
 0xb92   :  { %1973 = vtanh.f32 %v1118_v22  ;;  %v1133_v23 = vsub.f32 %v1118_v22, %v1110_v15  ;;  %v1307_v15 = vld [vmem:[#allocation9 + $0x30] sm:$0xff]  ;;  %v1837_v22 = vpack.c.bf16 %v1312_v20, %v1310_v17 }
 0xb93   :  { %v1835_v55 = vpack.c.bf16 %v1307_v15, %v1305_v54  ;;  %v1458_v54 = vld [vmem:[#allocation11 + $0x20] sm:$0xff]  ;;  %v1459_v15 = vld [vmem:[#allocation11 + $0x28] sm:$0xff]  ;;  %v1460_v20 = vld [vmem:[#allocation11 + $0x30] sm:$0xff] }
 0xb94   :  { %1135 = vrot.lane.b32.xlu1 %v1133_v23, %s2101_s17  ;;  %v1309_v23 = vld [vmem:[#allocation9 + $0x40] sm:$0xff]  ;;  %v1853_v17 = vpack.c.bf16 %v1459_v15, %v1458_v54 }
 0xb9c   :  { %v1974_v25 = vpop.eup %1973 }
 0xb9d   :  { %v2467_v26 = vmul.f32 %v1974_v25, %v1972_v24  ;;  %v1311_v24 = vld [vmem:[#allocation9 + $0x50] sm:$0xff] }
 0xb9e   :  { %v1839_v25 = vpack.c.bf16 %v1311_v24, %v1309_v23 }
 0xb9f   :  { %v1125_v34 = vsub.f32 %v2467_v26, %v1123_v32  ;;  %v1314_v32 = vld [vmem:[#allocation9 + $0x68] sm:$0xff] }
 0xba1   :  { %1127 = vrot.lane.b32.xlu0 %v1125_v34, %s2101_s17  ;;  %v1316_v34 = vld [vmem:[#allocation9 + $0x78] sm:$0xff] }
 0xc06   :  { %v1136_v36 = vpop.permute.xlu1 %1135 }
 0xc07   :  { %v1138_v16 = vmul.f32 %v1136_v36, %v2474_v35  ;;  %v1841_v36 = vpack.c.bf16 %v1316_v34, %v1314_v32 }
 0xc09   :  { %v1139_v51 = vadd.f32 %v1138_v16, %v1000_v60  ;;  %v1313_v16 = vld [vmem:[#allocation9 + $0x60] sm:$0xff] }
 0xc0b   :  { %1140 = vst.msk [vmem:[#allocation4] sm:$0xff] %vm250_vm0, %v1139_v51  ;;  %v1315_v51 = vld [vmem:[#allocation9 + $0x70] sm:$0xff] }
 0xc12   :  { %v2478_v39 = vld [vmem:[#allocation4] sm:$0xff] }
 0xc13   :  { %v1128_v52 = vpop.permute.xlu0 %1127  ;;  %1258 = vrot.lane.b32.xlu0 %v2478_v39, %s2101_s17 }
 0xc14   :  { %v1130_v40 = vmul.f32 %v1128_v52, %v2474_v35 }
 0xc16   :  { %v1131_v41 = vadd.f32 %v1130_v40, %v999_v4  ;;  %v1302_v4 = vld [vmem:[#allocation9 + $0x8] sm:$0xff]  ;;  %v1843_v40 = vpack.c.bf16 %v1315_v51, %v1313_v16 }
 0xc17   :  { %v1829_v18 = vpack.c.bf16 %v1304_v58, %v1302_v4  ;;  %v232_v4 = vadd.f32 %v2312_v62, %v2317_v6  ;;  %v1455_v62 = vld [vmem:[#allocation11 + $0x8] sm:$0xff] }
 0xc18   :  { %1132 = vst.msk [vmem:[#allocation3] sm:$0xff] %vm250_vm0, %v1131_v41 }
 0xc19   :  { %1830 = vmatprep.subr.bf16.mxu0 %v1829_v18 }
 0xc1f   :  { %v2484_v43 = vld [vmem:[#allocation3] sm:$0xff] }
 0xc20   :  { %1650 = vmatmul.mubr.msk.f32.vlgmr.msra.gmra.mrb[8].mxu0 %vm250_vm0, %v2484_v43  ;;  %1271 = vrot.lane.b32.xlu0 %v2484_v43, %s2101_s17 }
 0xc21   :  { %1384 = vmatprep.mubr.f32.mxu0 %v2100_v0  ;;  %1832 = vmatpush1.bf16.msra.mxu0 %v1831_v21 }
 0xc22   :  { %1834 = vmatprep.subr.bf16.mxu0 %v1833_v42 }
 0xc25   :  { %1836 = vmatpush1.bf16.msra.mxu0 %v1835_v55 }
 0xc26   :  { %1838 = vmatprep.subr.bf16.mxu0 %v1837_v22  ;;  %v1461_v22 = vld [vmem:[#allocation11 + $0x38] sm:$0xff] }
 0xc27   :  { %v1857_v24 = vpack.c.bf16 %v1461_v22, %v1460_v20 }
 0xc29   :  { %1840 = vmatpush1.bf16.msra.mxu0 %v1839_v25 }
 0xc2a   :  { %1842 = vmatprep.subr.bf16.mxu0 %v1841_v36 }
 0xc2d   :  { %1844 = vmatpush1.bf16.msra.mxu0 %v1843_v40  ;;  %v1419_v40 = vld [vmem:[%s2601_s1 + $0x38] sm:$0xff] }
 0xc85   :  { %v1259_v9 = vpop.permute.xlu0 %1258 }
 0xcf3   :  { %v1237_v49 = vpop.f32.mrb[8].mxu0 }
 0xcf4   :  { %v1242_v50 = vadd.f32 %v1237_v49, %v224_v44  ;;  %v1239_v46 = vpop.f32.mrb[9].mxu0 }
 0xcf5   :  { %v1243_v56 = vadd.f32 %v1239_v46, %v226_v45  ;;  %v1272_v45 = vpop.permute.xlu0 %1271 }
 0xcf6   :  { %v1651_v59 = vmul.f32 -1.442695, %v1242_v50  ;;  %v2501_v50 = vld [vmem:[%s2601_s1 + $0x30] sm:$0xff] }
 0xcf7   :  { %v1652_v0 = vmul.f32 -1.442695, %v1243_v56 }
 0xcf8   :  { %1975 = vpow2.f32 %v1651_v59 }
 0xcf9   :  { %1977 = vtanh.f32 %v1243_v56 }
 0xd02   :  { %v1976_v47 = vpop.eup %1975 }
 0xd03   :  { %v1250_v60 = vadd.f32 1.0, %v1976_v47  ;;  %v1978_v27 = vpop.eup %1977 }
 0xd05   :  { %1979 = vrcp.f32 %v1250_v60 }
 0xd06   :  { %1981 = vpow2.f32 %v1652_v0 }
 0xd0f   :  { %v1980_v1 = vpop.eup %1979 }
 0xd10   :  { %v1262_v3 = vmul.f32 %v1980_v1, %v1978_v27  ;;  %v1982_v57 = vpop.eup %1981  ;;  %v1261_v12 = vmul.f32 %v1980_v1, %v1259_v9 }
 0xd11   :  { %v1251_v11 = vadd.f32 1.0, %v1982_v57 }
 0xd12   :  { %1264 = vrot.lane.b32.xlu1 %v1262_v3, %s2101_s17 }
 0xd13   :  { %1983 = vrcp.f32 %v1251_v11 }
 0xd1d   :  { %v1984_v52 = vpop.eup %1983 }
 0xd84   :  { %v1265_v30 = vpop.permute.xlu1 %1264 }
 0xd85   :  { %v1267_v31 = vadd.f32 %v1265_v30, %v1261_v12  ;;  %v1457_v30 = vld [vmem:[#allocation11 + $0x18] sm:$0xff] }
 0xd87   :  { %1985 = vtanh.f32 %v1267_v31  ;;  %v1282_v13 = vsub.f32 %v1267_v31, %v1259_v9 }
 0xd89   :  { %1284 = vrot.lane.b32.xlu0 %v1282_v13, %s2101_s17 }
 0xd91   :  { %v1986_v41 = vpop.eup %1985 }
 0xd92   :  { %v1269_v44 = vmul.f32 %v1986_v41, %v1984_v52 }
 0xd94   :  { %v1274_v49 = vsub.f32 %v1269_v44, %v1272_v45 }
 0xd96   :  { %1276 = vrot.lane.b32.xlu1 %v1274_v49, %s2101_s17 }
 0xdfb   :  { %v1285_v46 = vpop.permute.xlu0 %1284 }
 0xdfc   :  { %v1287_v56 = vmul.f32 %v1285_v46, %v2501_v50 }
 0xdfe   :  { %v1288_v59 = vadd.f32 %v1287_v56, %v2478_v39 }
 0xe00   :  { %1289 = vst.msk [vmem:[#allocation4] sm:$0xff] %vm250_vm0, %v1288_v59 }
 0xe07   :  { %v2506_v47 = vld [vmem:[#allocation4] sm:$0xff] }
 0xe08   :  { %1407 = vrot.lane.b32.xlu1 %v2506_v47, %s2101_s17  ;;  %v1277_v60 = vpop.permute.xlu1 %1276 }
 0xe09   :  { %v1279_v27 = vmul.f32 %v1277_v60, %v2501_v50 }
 0xe0b   :  { %v1280_v1 = vadd.f32 %v1279_v27, %v2484_v43 }
 0xe0c   :  { %396 = vrot.lane.b32.xlu1 %v2322_v29, %s2101_s17 }
 0xe0d   :  { %1281 = vst.msk [vmem:[#allocation3] sm:$0xff] %vm250_vm0, %v1280_v1 }
 0xe10   :  { %695 = vrot.lane.b32.xlu1 %v2375_v7, %s2101_s17  ;;  %v230_v7 = vadd.f32 %v2310_v61, %v2314_v63  ;;  %v1454_v61 = vld [vmem:[#allocation11] sm:$0xff]  ;;  %v1456_v63 = vld [vmem:[#allocation11 + $0x10] sm:$0xff] }
 0xe11   :  { %v1845_v6 = vpack.c.bf16 %v1455_v62, %v1454_v61  ;;  %v1849_v31 = vpack.c.bf16 %v1457_v30, %v1456_v63 }
 0xe13   :  { %1846 = vmatprep.subr.bf16.mxu1 %v1845_v6 }
 0xe14   :  { %v2517_v39 = vld [vmem:[#allocation3] sm:$0xff]  ;;  %1848 = vmatpush3.bf16.msra.mxu1 %v1845_v6 }
 0xe15   :  { %1653 = vmatmul.mubr.msk.f32.vlgmr.msra.gmra.mrb[10].mxu0 %vm250_vm0, %v2517_v39  ;;  %1850 = vmatprep.subr.bf16.mxu1 %v1849_v31 }
 0xe18   :  { %1852 = vmatpush3.bf16.msra.mxu1 %v1849_v31 }
 0xe19   :  { %1854 = vmatprep.subr.bf16.mxu1 %v1853_v17 }
 0xe1c   :  { %1856 = vmatpush3.bf16.msra.mxu1 %v1853_v17 }
 0xe1d   :  { %1858 = vmatprep.subr.bf16.mxu1 %v1857_v24 }
 0xe20   :  { %1860 = vmatpush3.bf16.msra.mxu1 %v1857_v24 }
 0xe7a   :  { %v2521_v3 = vpop.permute.xlu1 %1407 }
 0xe7e   :  { %v397_v0 = vpop.permute.xlu1 %396 }
 0xe7f   :  { %v399_v57 = vmul.f32 %v397_v0, %v2329_v33 }
 0xe81   :  { %400 = vst.msk [vmem:[#allocation5] sm:$0xff] %vm96_vm1, %v399_v57 }
 0xe82   :  { %402 = vst.msk [vmem:[#allocation5 + $0x38] sm:$0xff] %vm401_vm2, %v399_v57  ;;  %v696_v29 = vpop.permute.xlu1 %695 }
 0xe83   :  { %v698_v43 = vmul.f32 %v696_v29, %v2382_v10 }
 0xe85   :  { %699 = vst.msk [vmem:[#allocation5 + $0x10] sm:$0xff] %vm96_vm1, %v698_v43 }
 0xe86   :  { %700 = vst.msk [vmem:[#allocation5 + $0x28] sm:$0xff] %vm401_vm2, %v698_v43 }
 0xee8   :  { %v1386_v58 = vpop.f32.mrb[10].mxu0 }
 0xee9   :  { %v1391_v5 = vadd.f32 %v1386_v58, %v230_v7  ;;  %v1388_v33 = vpop.f32.mrb[11].mxu0  ;;  %v1656_v7 = vld [vmem:[%s2606_s6] ss:$0 sm:$0xff]  ;;  %s2065_s6 = scalar_lea.vmem %s1612_s25, 1024 }
 0xeea   :  { %v1392_v18 = vadd.f32 %v1388_v33, %v232_v4  ;;  %p2066_p10 = scmp.ne.s32.totalorder %s1612_s25, %s2065_s6  ;;  %p2071_p12 = scmp.lt.s32.totalorder %s2065_s6, %s2065_s6 }
 0xeeb   :  { %v1654_v8 = vmul.f32 -1.442695, %v1391_v5 }
 0xeec   :  { %v1655_v37 = vmul.f32 -1.442695, %v1392_v18  ;;  %p2072_p13 = por %p2071_p12, %p2070_p11 }
 0xeed   :  { %1987 = vpow2.f32 %v1654_v8 }
 0xeee   :  { %1989 = vtanh.f32 %v1392_v18  ;;  %p2073_p0 = pnand %p2072_p13, %p2066_p10 }
 0xef7   :  { %v1988_v9 = vpop.eup %1987 }
 0xef8   :  { %v1399_v11 = vadd.f32 1.0, %v1988_v9  ;;  %v1990_v10 = vpop.eup %1989 }
 0xefa   :  { %1991 = vrcp.f32 %v1399_v11 }
 0xefb   :  { %1993 = vpow2.f32 %v1655_v37 }
 0xf04   :  { %v1992_v21 = vpop.eup %1991 }
 0xf05   :  { %v1411_v12 = vmul.f32 %v1992_v21, %v1990_v10  ;;  %v1410_v13 = vmul.f32 %v1992_v21, %v2521_v3 }
 0xf07   :  { %1413 = vrot.lane.b32.xlu0 %v1411_v12, %s2101_s17 }
 0xf0b   :  { %546 = vrot.lane.b32.xlu0 %v2344_v14, %s2101_s17  ;;  %v1994_v14 = vpop.eup %1993 }
 0xf0c   :  { %v1400_v38 = vadd.f32 1.0, %v1994_v14 }
 0xf0e   :  { %1995 = vrcp.f32 %v1400_v38 }
 0xf0f   :  { %1291 = vrot.lane.b32.xlu0 %v1269_v44, %s2101_s17 }
 0xf13   :  { %844 = vrot.lane.b32.xlu0 %v2406_v48, %s2101_s17 }
 0xf17   :  { %993 = vrot.lane.b32.xlu0 %v2437_v28, %s2101_s17 }
 0xf18   :  { %v1996_v32 = vpop.eup %1995 }
 0xf79   :  { %v1414_v48 = vpop.permute.xlu0 %1413 }
 0xf7a   :  { %v1416_v42 = vadd.f32 %v1414_v48, %v1410_v13 }
 0xf7c   :  { %1997 = vtanh.f32 %v1416_v42 }
 0xf7d   :  { %v547_v55 = vpop.permute.xlu0 %546 }
 0xf7e   :  { %v549_v28 = vmul.f32 %v547_v55, %v2351_v19 }
 0xf80   :  { %550 = vst.msk [vmem:[#allocation5 + $0x8] sm:$0xff] %vm96_vm1, %v549_v28 }
 0xf81   :  { %551 = vst.msk [vmem:[#allocation5 + $0x30] sm:$0xff] %vm401_vm2, %v549_v28  ;;  %v1292_v23 = vpop.permute.xlu0 %1291 }
 0xf82   :  { %v1294_v25 = vmul.f32 %v1292_v23, %v2501_v50 }
 0xf84   :  { %1295 = vst.msk [vmem:[#allocation5 + $0x30] sm:$0xff] %vm96_vm1, %v1294_v25 }
 0xf85   :  { %1296 = vst.msk [vmem:[#allocation5 + $0x8] sm:$0xff] %vm401_vm2, %v1294_v25  ;;  %v845_v19 = vpop.permute.xlu0 %844 }
 0xf86   :  { %v1998_v34 = vpop.eup %1997  ;;  %v847_v36 = vmul.f32 %v845_v19, %v2413_v2  ;;  %v1431_v2 = vsub.f32 %v1416_v42, %v2521_v3 }
 0xf87   :  { %v1418_v16 = vmul.f32 %v1998_v34, %v1996_v32 }
 0xf88   :  { %848 = vst.msk [vmem:[#allocation5 + $0x18] sm:$0xff] %vm96_vm1, %v847_v36 }
 0xf89   :  { %849 = vst.msk [vmem:[#allocation5 + $0x20] sm:$0xff] %vm401_vm2, %v847_v36  ;;  %v994_v51 = vpop.permute.xlu0 %993  ;;  %1440 = vrot.lane.b32.xlu1 %v1418_v16, %s2101_s17 }
 0xf8a   :  { %v996_v52 = vmul.f32 %v994_v51, %v2444_v53 }
 0xf8b   :  { %v1452_v0 = vld [vmem:[#allocation5 + $0x30] sm:$0xff] }
 0xf8c   :  { %997 = vst.msk [vmem:[#allocation5 + $0x20] sm:$0xff] %vm96_vm1, %v996_v52  ;;  %v1447_v46 = vld [vmem:[#allocation5 + $0x8] sm:$0xff] }
 0xf8d   :  { %998 = vst.msk [vmem:[#allocation5 + $0x18] sm:$0xff] %vm401_vm2, %v996_v52  ;;  %1142 = vrot.lane.b32.xlu1 %v2467_v26, %s2101_s17 }
 0xf91   :  { %1420 = vrot.lane.b32.xlu1 %v2517_v39, %s2101_s17 }
 0xf93   :  { %v1450_v1 = vld [vmem:[#allocation5 + $0x20] sm:$0xff] }
 0xf95   :  { %1433 = vrot.lane.b32.xlu1 %v1431_v2, %s2101_s17 }
 0xffb   :  { %v1441_v41 = vpop.permute.xlu1 %1440 }
 0xffc   :  { %v1443_v53 = vmul.f32 %v1441_v41, %v1419_v40 }
 0xffe   :  { %1444 = vst.msk [vmem:[#allocation5 + $0x38] sm:$0xff] %vm96_vm1, %v1443_v53 }
 0xfff   :  { %1445 = vst.msk [vmem:[#allocation5] sm:$0xff] %vm401_vm2, %v1443_v53  ;;  %v1143_v44 = vpop.permute.xlu1 %1142 }
0x1000   :  { %v1145_v26 = vmul.f32 %v1143_v44, %v2474_v35  ;;  %v1449_v35 = vld [vmem:[#allocation5 + $0x18] sm:$0xff] }
0x1002   :  { %1146 = vst.msk [vmem:[#allocation5 + $0x28] sm:$0xff] %vm96_vm1, %v1145_v26 }
0x1003   :  { %1147 = vst.msk [vmem:[#allocation5 + $0x10] sm:$0xff] %vm401_vm2, %v1145_v26  ;;  %v1421_v45 = vpop.permute.xlu1 %1420 }
0x1004   :  { %v1423_v49 = vsub.f32 %v1418_v16, %v1421_v45 }
0x1005   :  { %v1453_v57 = vld [vmem:[#allocation5 + $0x38] sm:$0xff] }
0x1006   :  { %v1446_v50 = vld [vmem:[#allocation5] sm:$0xff]  ;;  %1425 = vrot.lane.b32.xlu0 %v1423_v49, %s2101_s17 }
0x1007   :  { %1697 = vmatprep.mubr.msk.f32.mxu1 %vm250_vm0, %v1446_v50  ;;  %v1434_v56 = vpop.permute.xlu1 %1433 }
0x1008   :  { %1698 = vmatmul.mubr.msk.f32.vlgmr.msra.gmra.mrb[16].mxu1 %vm250_vm0, %v1447_v46  ;;  %v1436_v59 = vmul.f32 %v1434_v56, %v1419_v40 }
0x1009   :  { %v1451_v3 = vld [vmem:[#allocation5 + $0x28] sm:$0xff] }
0x100a   :  { %v1448_v60 = vld [vmem:[#allocation5 + $0x10] sm:$0xff]  ;;  %v1437_v27 = vadd.f32 %v1436_v59, %v2506_v47 }
0x100b   :  { %1700 = vmatprep.mubr.msk.f32.mxu1 %vm250_vm0, %v1448_v60 }
0x100c   :  { %1701 = vmatmul.mubr.msk.f32.gmra.mrb[18].mxu1 %vm250_vm0, %v1449_v35  ;;  %1438 = vst.msk [vmem:[#allocation4] sm:$0xff] %vm250_vm0, %v1437_v27 }
0x100d   :  { %1703 = vmatprep.mubr.msk.f32.mxu1 %vm250_vm0, %v1450_v1 }
0x1010   :  { %1704 = vmatmul.mubr.msk.f32.gmra.mrb[20].mxu1 %vm250_vm0, %v1451_v3 }
0x1011   :  { %1706 = vmatprep.mubr.msk.f32.mxu1 %vm250_vm0, %v1452_v0 }
0x1014   :  { %1707 = vmatmul.mubr.msk.f32.gmra.mrb[22].mxu1 %vm250_vm0, %v1453_v57 }
0x1078   :  { %v1426_v47 = vpop.permute.xlu0 %1425 }
0x1079   :  { %v1428_v29 = vmul.f32 %v1426_v47, %v1419_v40 }
0x107b   :  { %v1429_v43 = vadd.f32 %v1428_v29, %v2517_v39 }
0x107d   :  { %1430 = vst.msk [vmem:[#allocation3] sm:$0xff] %vm250_vm0, %v1429_v43 }
0x10db   :  { %v1699_v4 = vpop.f32.mrb[16].mxu1 }
0x10dc   :  { %v1565_v58 = vadd.f32 %v1699_v4, %v1656_v7  ;;  %v1559_v5 = vpop.f32.mrb[17].mxu1 }
0x10dd   :  { %v1560_v33 = vadd.f32 %v1656_v7, %v1559_v5 }
0x10de   :  { %1599 = vst [vmem:[#allocation12 + $0x8] sm:$0xff] %v1565_v58 }
0x10df   :  { %1598 = vst [vmem:[#allocation12] sm:$0xff] %v1560_v33  ;;  %v1702_v18 = vpop.f32.mrb[18].mxu1 }
0x10e0   :  { %v1575_v8 = vadd.f32 %v1702_v18, %v1656_v7  ;;  %v1569_v9 = vpop.f32.mrb[19].mxu1 }
0x10e1   :  { %v1570_v11 = vadd.f32 %v1656_v7, %v1569_v9 }
0x10e2   :  { %1601 = vst [vmem:[#allocation12 + $0x18] sm:$0xff] %v1575_v8 }
0x10e3   :  { %1600 = vst [vmem:[#allocation12 + $0x10] sm:$0xff] %v1570_v11  ;;  %v1705_v10 = vpop.f32.mrb[20].mxu1 }
0x10e4   :  { %v1585_v39 = vadd.f32 %v1705_v10, %v1656_v7  ;;  %v1579_v21 = vpop.f32.mrb[21].mxu1 }
0x10e5   :  { %v1580_v12 = vadd.f32 %v1656_v7, %v1579_v21 }
0x10e6   :  { %1603 = vst [vmem:[#allocation12 + $0x28] sm:$0xff] %v1585_v39 }
0x10e7   :  { %1602 = vst [vmem:[#allocation12 + $0x20] sm:$0xff] %v1580_v12  ;;  %v1708_v61 = vpop.f32.mrb[22].mxu1 }
0x10e8   :  { %v1595_v62 = vadd.f32 %v1708_v61, %v1656_v7  ;;  %v1589_v63 = vpop.f32.mrb[23].mxu1 }
0x10e9   :  { %v1590_v6 = vadd.f32 %v1656_v7, %v1589_v63 }
0x10ea   :  { %1605 = vst [vmem:[#allocation12 + $0x38] sm:$0xff] %v1595_v62 }
0x10eb   :  { %1604 = vst [vmem:[#allocation12 + $0x30] sm:$0xff] %v1590_v6 }
0x10ec   :  { %2076 = shalt.err (!%p2073_p0)
}
0x10ed   :  { %s2077_s29 = scalar_lea.hbm %s2607_s7, 1024 }
0x10ee   :  { %p2078_p1 = scmp.ne.s32.totalorder %s2607_s7, %s2077_s29  ;;  %p2081_p2 = scmp.lt.u32.totalorder %s2077_s29, %s2607_s7 }
0x10f0   :  { %p2083_p3 = pnand %p2081_p2, %p2078_p1 }
0x10f2   :  { %2086 = shalt.err (!%p2083_p3)
}
0x10f3   :  { %1617 = dma.vmem_to_hbm [thread:$0]  %s1612_s25, 1024, %s2607_s7, [#allocation8], %s2098_s2, %s2098_s2, %s2099_s27  }
0x10f4   :  { %2091 = dma.done.wait [#allocation8], 1024  }
0x10f5   :  { %2092 = vsyncadd [#allocation8], 4294966272 }
0x10f6   :  { %1621 = vsyncpa [#allocation7], 1 }
0x10f7   :  { %1622 = vsyncpa [#allocation10], 1 }
0x10f8   :  { %1623 = vsyncpa [#allocation8], 1 }

</bundles_post_ra>
